<compile_context>
chip_gen: v5e
topology: v5e:2x2
jax: 0.10.0
libtpu: 0.0.40
codegen_flags: <defaults>
</compile_context>

<pallas_src>
import functools

import jax
import jax.numpy as jnp
from jax import lax
from jax.experimental import pallas as pl
from jax.experimental.pallas import tpu as pltpu


def _round_up(x, m):
    return ((x + m - 1) // m) * m


def _bigru_kernel(x2_ref, wcat_ref, bcat_ref, whh_ref, bhhn_ref,
                  out_ref, gx_ref, *, seq_len, b_pad):
    """Fused bidirectional GRU.

    x2_ref:   (T*B_pad, 2D)   row block t holds [x_t | x_{T-1-t}] per batch row
    wcat_ref: (2D, 3*GP)      fused input weights; each gate block = [fwd H | bwd H | 0]
    bcat_ref: (1, 3*GP)       b_ih (+ b_hh for r,z) folded per gate block
    whh_ref:  (GP, 3*GP)      block-diagonal recurrent weights (padded rows zero)
    bhhn_ref: (1, GP)         b_hh of the n gate (must stay inside the loop)
    out_ref:  (T*B_pad, GP)   per-step fused hidden [h_f(t) | h_b(T-1-t) | 0]
    gx_ref:   (T*B_pad, 3*GP) VMEM scratch for the hoisted input projection
    """
    gp = out_ref.shape[-1]

    # (1) Hoisted input projection: one big MXU matmul for the whole sequence,
    #     both directions at once; removes 2*T tiny matmuls from the serial chain.
    gx_ref[...] = (
        jnp.dot(x2_ref[...], wcat_ref[...], preferred_element_type=jnp.float32)
        + bcat_ref[...])

    # Loop-invariant loads hoisted out of the recurrence.
    whh = whh_ref[...]
    bhh_n = bhhn_ref[...]

    h = jnp.zeros((b_pad, gp), jnp.float32)  # [h_fwd | h_bwd | zero pad] lanes

    # (2) Fully unrolled recurrence (T small & static). One fused
    #     (B_pad, GP) @ (GP, 3GP) MXU matmul per step covers both directions;
    #     gate slices / stores are 128-lane aligned whole vregs.
    for i in range(seq_len):
        row = i * b_pad
        gx = gx_ref[row:row + b_pad, :]                              # (B_pad, 3GP)
        gh = jnp.dot(h, whh, preferred_element_type=jnp.float32)     # (B_pad, 3GP)
        rz = jax.nn.sigmoid(gx[:, :2 * gp] + gh[:, :2 * gp])
        r = rz[:, :gp]
        z = rz[:, gp:]
        n = jnp.tanh(gx[:, 2 * gp:] + r * (gh[:, 2 * gp:] + bhh_n))
        h = (1.0 - z) * n + z * h
        out_ref[row:row + b_pad, :] = h                               # dense (8,128) store
    # TODO(synk): for long sequences, stream T-chunks via a grid ("arbitrary")
    # with h carried in VMEM scratch instead of whole-sequence residency.


def init_encoder_rnn_params(key, input_d, hidden_size):
    """PyTorch-style init: uniform(-1/sqrt(H), 1/sqrt(H)) for all GRU params."""
    k = 1.0 / jnp.sqrt(jnp.float32(hidden_size))
    shapes = {
        "wih_f": (3 * hidden_size, input_d),
        "whh_f": (3 * hidden_size, hidden_size),
        "bih_f": (3 * hidden_size,),
        "bhh_f": (3 * hidden_size,),
        "wih_b": (3 * hidden_size, input_d),
        "whh_b": (3 * hidden_size, hidden_size),
        "bih_b": (3 * hidden_size,),
        "bhh_b": (3 * hidden_size,),
    }
    keys = jax.random.split(key, len(shapes))
    return {name: jax.random.uniform(kk, shapes[name], jnp.float32,
                                     minval=-k, maxval=k)
            for name, kk in zip(shapes, keys)}


def pack_encoder_rnn_params(params, input_d, hidden_size):
    """One-time packing of PyTorch-layout params into the fused kernel layout."""
    D, H = input_d, hidden_size
    GP = max(128, _round_up(2 * H, 128))   # lanes per fused gate block

    wih_f = params["wih_f"].T   # (D, 3H)
    wih_b = params["wih_b"].T
    whh_f = params["whh_f"].T   # (H, 3H)
    whh_b = params["whh_b"].T
    bih_f, bhh_f = params["bih_f"], params["bhh_f"]
    bih_b, bhh_b = params["bih_b"], params["bhh_b"]

    def ih_block(g):
        wf = wih_f[:, g * H:(g + 1) * H]                          # (D, H)
        wb = wih_b[:, g * H:(g + 1) * H]                          # (D, H)
        top = jnp.concatenate([wf, jnp.zeros((D, GP - H), jnp.float32)], axis=1)
        bot = jnp.concatenate([jnp.zeros((D, H), jnp.float32), wb,
                               jnp.zeros((D, GP - 2 * H), jnp.float32)], axis=1)
        return jnp.concatenate([top, bot], axis=0)                # (2D, GP)

    def hh_block(g):
        wf = whh_f[:, g * H:(g + 1) * H]                          # (H, H)
        wb = whh_b[:, g * H:(g + 1) * H]
        top = jnp.concatenate([wf, jnp.zeros((H, GP - H), jnp.float32)], axis=1)
        mid = jnp.concatenate([jnp.zeros((H, H), jnp.float32), wb,
                               jnp.zeros((H, GP - 2 * H), jnp.float32)], axis=1)
        pad = jnp.zeros((GP - 2 * H, GP), jnp.float32)
        return jnp.concatenate([top, mid, pad], axis=0)           # (GP, GP)

    def lane_vec(vf, vb):
        return jnp.concatenate([vf, vb, jnp.zeros((GP - 2 * H,), jnp.float32)])

    w_cat = jnp.concatenate([ih_block(g) for g in range(3)], axis=1)  # (2D, 3GP)
    whh_p = jnp.concatenate([hh_block(g) for g in range(3)], axis=1)  # (GP, 3GP)

    # Fold b_ih + b_hh for r, z; for n only b_ih (b_hh_n is scaled by r in-loop).
    b_r = lane_vec(bih_f[0:H] + bhh_f[0:H], bih_b[0:H] + bhh_b[0:H])
    b_z = lane_vec(bih_f[H:2 * H] + bhh_f[H:2 * H],
                   bih_b[H:2 * H] + bhh_b[H:2 * H])
    b_n = lane_vec(bih_f[2 * H:], bih_b[2 * H:])
    b_cat = jnp.concatenate([b_r, b_z, b_n]).reshape(1, 3 * GP)
    bhh_n = lane_vec(bhh_f[2 * H:], bhh_b[2 * H:]).reshape(1, GP)

    return {"w_cat": w_cat, "whh_p": whh_p, "b_cat": b_cat, "bhh_n": bhh_n}


@functools.partial(jax.jit, static_argnames=("hidden_size",))
def encoder_rnn_forward(x, packed, *, hidden_size):
    """x: (B, T, D) float32 -> (output (B, T, 2H), h_n (2, B, H))."""
    B, T, D = x.shape
    H = hidden_size
    GP = packed["whh_p"].shape[0]
    B_pad = _round_up(max(B, 8), 8)

    # Time-major, batch padded to a full sublane tile; fuse both directions:
    # row block t carries [x_t | x_{T-1-t}] along the feature axis.
    x_tbd = jnp.transpose(x, (1, 0, 2)).astype(jnp.float32)       # (T, B, D)
    x_tbd = jnp.pad(x_tbd, ((0, 0), (0, B_pad - B), (0, 0)))      # (T, B_pad, D)
    x_cat = jnp.concatenate([x_tbd, x_tbd[::-1]], axis=-1)        # (T, B_pad, 2D)
    x2 = x_cat.reshape(T * B_pad, 2 * D)

    vmem = pl.BlockSpec(memory_space=pltpu.MemorySpace.VMEM)
    out = pl.pallas_call(
        functools.partial(_bigru_kernel, seq_len=T, b_pad=B_pad),
        out_shape=jax.ShapeDtypeStruct((T * B_pad, GP), jnp.float32),
        in_specs=[vmem] * 5,
        out_specs=vmem,
        scratch_shapes=[pltpu.VMEM((T * B_pad, 3 * GP), jnp.float32)],
        compiler_params=pltpu.CompilerParams(
            vmem_limit_bytes=32 * 1024 * 1024),
    )(x2, packed["w_cat"], packed["b_cat"], packed["whh_p"], packed["bhh_n"])

    out = out.reshape(T, B_pad, GP)
    out_f = out[:, :B, 0:H]                     # forward hidden at time t
    out_b = out[::-1, :B, H:2 * H]              # backward hidden, restored order
    output = jnp.transpose(
        jnp.concatenate([out_f, out_b], axis=-1), (1, 0, 2))      # (B, T, 2H)
    h_n = jnp.stack([out[T - 1, :B, 0:H], out[T - 1, :B, H:2 * H]], axis=0)
    return output, h_n


def _reference_bigru(x, params):
    """Pure-JAX reference for nn.GRU(bidirectional=True, batch_first=True)."""
    B, T, D = x.shape
    H = params["whh_f"].shape[1]

    def cell(x_t, h, wih, whh, bih, bhh):
        gx = x_t @ wih.T + bih
        gh = h @ whh.T + bhh
        r = jax.nn.sigmoid(gx[:, :H] + gh[:, :H])
        z = jax.nn.sigmoid(gx[:, H:2 * H] + gh[:, H:2 * H])
        n = jnp.tanh(gx[:, 2 * H:] + r * gh[:, 2 * H:])
        return (1.0 - z) * n + z * h

    h_f = jnp.zeros((B, H), jnp.float32)
    h_b = jnp.zeros((B, H), jnp.float32)
    outs_f = []
    outs_b = [None] * T
    for t in range(T):
        h_f = cell(x[:, t], h_f, params["wih_f"], params["whh_f"],
                   params["bih_f"], params["bhh_f"])
        outs_f.append(h_f)
    for t in range(T - 1, -1, -1):
        h_b = cell(x[:, t], h_b, params["wih_b"], params["whh_b"],
                   params["bih_b"], params["bhh_b"])
        outs_b[t] = h_b
    out_f = jnp.stack(outs_f, axis=1)
    out_b = jnp.stack(outs_b, axis=1)
    output = jnp.concatenate([out_f, out_b], axis=-1)
    h_n = jnp.stack([out_f[:, -1], out_b[:, 0]], axis=0)
    return output, h_n


if __name__ == "__main__":
    B, T, D, H = 2, 8, 16, 32

    key = jax.random.PRNGKey(0)
    k_param, k_x = jax.random.split(key)
    params = init_encoder_rnn_params(k_param, input_d=D, hidden_size=H)
    packed = pack_encoder_rnn_params(params, input_d=D, hidden_size=H)
    x = jax.random.normal(k_x, (B, T, D), jnp.float32)

    output, h_n = encoder_rnn_forward(x, packed, hidden_size=H)
    jax.block_until_ready((output, h_n))

    assert output.shape == (B, T, 2 * H), output.shape
    assert h_n.shape == (2, B, H), h_n.shape

    ref_output, ref_h_n = _reference_bigru(x, params)
    assert jnp.allclose(output, ref_output, atol=1e-4, rtol=1e-4), (
        float(jnp.max(jnp.abs(output - ref_output))))
    assert jnp.allclose(h_n, ref_h_n, atol=1e-4, rtol=1e-4), (
        float(jnp.max(jnp.abs(h_n - ref_h_n))))

    print("KERNEL_OK")
</pallas_src>

<mosaic_0001>
module attributes {stable_mosaic.version = 11 : i64} {
  func.func @_bigru_kernel(%arg0: memref<64x32xf32, #tpu.memory_space<vmem>>, %arg1: memref<32x384xf32, #tpu.memory_space<vmem>>, %arg2: memref<1x384xf32, #tpu.memory_space<vmem>>, %arg3: memref<128x384xf32, #tpu.memory_space<vmem>>, %arg4: memref<1x128xf32, #tpu.memory_space<vmem>>, %arg5: memref<64x128xf32, #tpu.memory_space<vmem>>, %arg6: memref<64x384xf32, #tpu.memory_space<vmem>>) attributes {dimension_semantics = [], scalar_prefetch = 0 : i64, scratch_operands = 1 : i64, tpu.core_type = #tpu.core_type<tc>} {
    %c0 = arith.constant 0 : index
    %c0_0 = arith.constant 0 : index
    %0 = vector.load %arg0[%c0, %c0_0] : memref<64x32xf32, #tpu.memory_space<vmem>>, vector<64x32xf32>
    %c0_1 = arith.constant 0 : index
    %c0_2 = arith.constant 0 : index
    %1 = vector.load %arg1[%c0_1, %c0_2] : memref<32x384xf32, #tpu.memory_space<vmem>>, vector<32x384xf32>
    %cst = arith.constant dense<0.000000e+00> : vector<64x384xf32>
    %2 = tpu.matmul %0, %1, %cst {dimension_numbers = #tpu.dot_dimension_numbers<[1], [0], [0], [1], [0, 0, 1, 1], [], []>} : vector<64x32xf32>, vector<32x384xf32>, vector<64x384xf32> -> vector<64x384xf32>
    %c0_3 = arith.constant 0 : index
    %c0_4 = arith.constant 0 : index
    %3 = vector.load %arg2[%c0_3, %c0_4] : memref<1x384xf32, #tpu.memory_space<vmem>>, vector<1x384xf32>
    %4 = vector.broadcast %3 : vector<1x384xf32> to vector<64x384xf32>
    %5 = arith.addf %2, %4 : vector<64x384xf32>
    %c0_5 = arith.constant 0 : index
    %c0_6 = arith.constant 0 : index
    %6 = vector.load %arg6[%c0_5, %c0_6] : memref<64x384xf32, #tpu.memory_space<vmem>>, vector<64x384xf32>
    tpu.vector_store %arg6[%c0_5, %c0_6], %5 {strides = array<i32>} : memref<64x384xf32, #tpu.memory_space<vmem>>, vector<64x384xf32>,
    %c0_7 = arith.constant 0 : index
    %c0_8 = arith.constant 0 : index
    %7 = vector.load %arg3[%c0_7, %c0_8] : memref<128x384xf32, #tpu.memory_space<vmem>>, vector<128x384xf32>
    %c0_9 = arith.constant 0 : index
    %c0_10 = arith.constant 0 : index
    %8 = vector.load %arg4[%c0_9, %c0_10] : memref<1x128xf32, #tpu.memory_space<vmem>>, vector<1x128xf32>
    %cst_11 = arith.constant 0.000000e+00 : f32
    %9 = vector.broadcast %cst_11 : f32 to vector<8x128xf32>
    %c0_12 = arith.constant 0 : index
    %c0_13 = arith.constant 0 : index
    %10 = vector.load %arg6[%c0_12, %c0_13] : memref<64x384xf32, #tpu.memory_space<vmem>>, vector<8x384xf32>
    %cst_14 = arith.constant dense<0.000000e+00> : vector<8x384xf32>
    %11 = tpu.matmul %9, %7, %cst_14 {dimension_numbers = #tpu.dot_dimension_numbers<[1], [0], [0], [1], [0, 0, 1, 1], [], []>} : vector<8x128xf32>, vector<128x384xf32>, vector<8x384xf32> -> vector<8x384xf32>
    %12 = vector.extract_strided_slice %10 {offsets = [0, 0], sizes = [8, 256], strides = [1, 1]} : vector<8x384xf32> to vector<8x256xf32>
    %13 = vector.extract_strided_slice %11 {offsets = [0, 0], sizes = [8, 256], strides = [1, 1]} : vector<8x384xf32> to vector<8x256xf32>
    %14 = arith.addf %12, %13 : vector<8x256xf32>
    %15 = arith.negf %14 : vector<8x256xf32>
    %16 = math.exp %15 : vector<8x256xf32>
    %cst_15 = arith.constant 1.000000e+00 : f32
    %17 = vector.broadcast %cst_15 : f32 to vector<8x256xf32>
    %18 = arith.addf %17, %16 : vector<8x256xf32>
    %19 = arith.divf %17, %18 : vector<8x256xf32>
    %20 = vector.extract_strided_slice %19 {offsets = [0, 0], sizes = [8, 128], strides = [1, 1]} : vector<8x256xf32> to vector<8x128xf32>
    %21 = vector.extract_strided_slice %19 {offsets = [0, 128], sizes = [8, 128], strides = [1, 1]} : vector<8x256xf32> to vector<8x128xf32>
    %22 = vector.extract_strided_slice %10 {offsets = [0, 256], sizes = [8, 128], strides = [1, 1]} : vector<8x384xf32> to vector<8x128xf32>
    %23 = vector.extract_strided_slice %11 {offsets = [0, 256], sizes = [8, 128], strides = [1, 1]} : vector<8x384xf32> to vector<8x128xf32>
    %24 = vector.broadcast %8 : vector<1x128xf32> to vector<8x128xf32>
    %25 = arith.addf %23, %24 : vector<8x128xf32>
    %26 = arith.mulf %20, %25 : vector<8x128xf32>
    %27 = arith.addf %22, %26 : vector<8x128xf32>
    %28 = math.tanh %27 : vector<8x128xf32>
    %cst_16 = arith.constant 1.000000e+00 : f32
    %29 = vector.broadcast %cst_16 : f32 to vector<8x128xf32>
    %30 = arith.subf %29, %21 : vector<8x128xf32>
    %31 = arith.mulf %30, %28 : vector<8x128xf32>
    %32 = arith.mulf %21, %9 : vector<8x128xf32>
    %33 = arith.addf %31, %32 : vector<8x128xf32>
    %c0_17 = arith.constant 0 : index
    %c0_18 = arith.constant 0 : index
    %34 = vector.load %arg5[%c0_17, %c0_18] : memref<64x128xf32, #tpu.memory_space<vmem>>, vector<8x128xf32>
    tpu.vector_store %arg5[%c0_17, %c0_18], %33 {strides = array<i32>} : memref<64x128xf32, #tpu.memory_space<vmem>>, vector<8x128xf32>,
    %c8 = arith.constant 8 : index
    %c0_19 = arith.constant 0 : index
    %35 = vector.load %arg6[%c8, %c0_19] : memref<64x384xf32, #tpu.memory_space<vmem>>, vector<8x384xf32>
    %cst_20 = arith.constant dense<0.000000e+00> : vector<8x384xf32>
    %36 = tpu.matmul %33, %7, %cst_20 {dimension_numbers = #tpu.dot_dimension_numbers<[1], [0], [0], [1], [0, 0, 1, 1], [], []>} : vector<8x128xf32>, vector<128x384xf32>, vector<8x384xf32> -> vector<8x384xf32>
    %37 = vector.extract_strided_slice %35 {offsets = [0, 0], sizes = [8, 256], strides = [1, 1]} : vector<8x384xf32> to vector<8x256xf32>
    %38 = vector.extract_strided_slice %36 {offsets = [0, 0], sizes = [8, 256], strides = [1, 1]} : vector<8x384xf32> to vector<8x256xf32>
    %39 = arith.addf %37, %38 : vector<8x256xf32>
    %40 = arith.negf %39 : vector<8x256xf32>
    %41 = math.exp %40 : vector<8x256xf32>
    %cst_21 = arith.constant 1.000000e+00 : f32
    %42 = vector.broadcast %cst_21 : f32 to vector<8x256xf32>
    %43 = arith.addf %42, %41 : vector<8x256xf32>
    %44 = arith.divf %42, %43 : vector<8x256xf32>
    %45 = vector.extract_strided_slice %44 {offsets = [0, 0], sizes = [8, 128], strides = [1, 1]} : vector<8x256xf32> to vector<8x128xf32>
    %46 = vector.extract_strided_slice %44 {offsets = [0, 128], sizes = [8, 128], strides = [1, 1]} : vector<8x256xf32> to vector<8x128xf32>
    %47 = vector.extract_strided_slice %35 {offsets = [0, 256], sizes = [8, 128], strides = [1, 1]} : vector<8x384xf32> to vector<8x128xf32>
    %48 = vector.extract_strided_slice %36 {offsets = [0, 256], sizes = [8, 128], strides = [1, 1]} : vector<8x384xf32> to vector<8x128xf32>
    %49 = vector.broadcast %8 : vector<1x128xf32> to vector<8x128xf32>
    %50 = arith.addf %48, %49 : vector<8x128xf32>
    %51 = arith.mulf %45, %50 : vector<8x128xf32>
    %52 = arith.addf %47, %51 : vector<8x128xf32>
    %53 = math.tanh %52 : vector<8x128xf32>
    %cst_22 = arith.constant 1.000000e+00 : f32
    %54 = vector.broadcast %cst_22 : f32 to vector<8x128xf32>
    %55 = arith.subf %54, %46 : vector<8x128xf32>
    %56 = arith.mulf %55, %53 : vector<8x128xf32>
    %57 = arith.mulf %46, %33 : vector<8x128xf32>
    %58 = arith.addf %56, %57 : vector<8x128xf32>
    %c8_23 = arith.constant 8 : index
    %c0_24 = arith.constant 0 : index
    %59 = vector.load %arg5[%c8_23, %c0_24] : memref<64x128xf32, #tpu.memory_space<vmem>>, vector<8x128xf32>
    tpu.vector_store %arg5[%c8_23, %c0_24], %58 {strides = array<i32>} : memref<64x128xf32, #tpu.memory_space<vmem>>, vector<8x128xf32>,
    %c16 = arith.constant 16 : index
    %c0_25 = arith.constant 0 : index
    %60 = vector.load %arg6[%c16, %c0_25] : memref<64x384xf32, #tpu.memory_space<vmem>>, vector<8x384xf32>
    %cst_26 = arith.constant dense<0.000000e+00> : vector<8x384xf32>
    %61 = tpu.matmul %58, %7, %cst_26 {dimension_numbers = #tpu.dot_dimension_numbers<[1], [0], [0], [1], [0, 0, 1, 1], [], []>} : vector<8x128xf32>, vector<128x384xf32>, vector<8x384xf32> -> vector<8x384xf32>
    %62 = vector.extract_strided_slice %60 {offsets = [0, 0], sizes = [8, 256], strides = [1, 1]} : vector<8x384xf32> to vector<8x256xf32>
    %63 = vector.extract_strided_slice %61 {offsets = [0, 0], sizes = [8, 256], strides = [1, 1]} : vector<8x384xf32> to vector<8x256xf32>
    %64 = arith.addf %62, %63 : vector<8x256xf32>
    %65 = arith.negf %64 : vector<8x256xf32>
    %66 = math.exp %65 : vector<8x256xf32>
    %cst_27 = arith.constant 1.000000e+00 : f32
    %67 = vector.broadcast %cst_27 : f32 to vector<8x256xf32>
    %68 = arith.addf %67, %66 : vector<8x256xf32>
    %69 = arith.divf %67, %68 : vector<8x256xf32>
    %70 = vector.extract_strided_slice %69 {offsets = [0, 0], sizes = [8, 128], strides = [1, 1]} : vector<8x256xf32> to vector<8x128xf32>
    %71 = vector.extract_strided_slice %69 {offsets = [0, 128], sizes = [8, 128], strides = [1, 1]} : vector<8x256xf32> to vector<8x128xf32>
    %72 = vector.extract_strided_slice %60 {offsets = [0, 256], sizes = [8, 128], strides = [1, 1]} : vector<8x384xf32> to vector<8x128xf32>
    %73 = vector.extract_strided_slice %61 {offsets = [0, 256], sizes = [8, 128], strides = [1, 1]} : vector<8x384xf32> to vector<8x128xf32>
    %74 = vector.broadcast %8 : vector<1x128xf32> to vector<8x128xf32>
    %75 = arith.addf %73, %74 : vector<8x128xf32>
    %76 = arith.mulf %70, %75 : vector<8x128xf32>
    %77 = arith.addf %72, %76 : vector<8x128xf32>
    %78 = math.tanh %77 : vector<8x128xf32>
    %cst_28 = arith.constant 1.000000e+00 : f32
    %79 = vector.broadcast %cst_28 : f32 to vector<8x128xf32>
    %80 = arith.subf %79, %71 : vector<8x128xf32>
    %81 = arith.mulf %80, %78 : vector<8x128xf32>
    %82 = arith.mulf %71, %58 : vector<8x128xf32>
    %83 = arith.addf %81, %82 : vector<8x128xf32>
    %c16_29 = arith.constant 16 : index
    %c0_30 = arith.constant 0 : index
    %84 = vector.load %arg5[%c16_29, %c0_30] : memref<64x128xf32, #tpu.memory_space<vmem>>, vector<8x128xf32>
    tpu.vector_store %arg5[%c16_29, %c0_30], %83 {strides = array<i32>} : memref<64x128xf32, #tpu.memory_space<vmem>>, vector<8x128xf32>,
    %c24 = arith.constant 24 : index
    %c0_31 = arith.constant 0 : index
    %85 = vector.load %arg6[%c24, %c0_31] : memref<64x384xf32, #tpu.memory_space<vmem>>, vector<8x384xf32>
    %cst_32 = arith.constant dense<0.000000e+00> : vector<8x384xf32>
    %86 = tpu.matmul %83, %7, %cst_32 {dimension_numbers = #tpu.dot_dimension_numbers<[1], [0], [0], [1], [0, 0, 1, 1], [], []>} : vector<8x128xf32>, vector<128x384xf32>, vector<8x384xf32> -> vector<8x384xf32>
    %87 = vector.extract_strided_slice %85 {offsets = [0, 0], sizes = [8, 256], strides = [1, 1]} : vector<8x384xf32> to vector<8x256xf32>
    %88 = vector.extract_strided_slice %86 {offsets = [0, 0], sizes = [8, 256], strides = [1, 1]} : vector<8x384xf32> to vector<8x256xf32>
    %89 = arith.addf %87, %88 : vector<8x256xf32>
    %90 = arith.negf %89 : vector<8x256xf32>
    %91 = math.exp %90 : vector<8x256xf32>
    %cst_33 = arith.constant 1.000000e+00 : f32
    %92 = vector.broadcast %cst_33 : f32 to vector<8x256xf32>
    %93 = arith.addf %92, %91 : vector<8x256xf32>
    %94 = arith.divf %92, %93 : vector<8x256xf32>
    %95 = vector.extract_strided_slice %94 {offsets = [0, 0], sizes = [8, 128], strides = [1, 1]} : vector<8x256xf32> to vector<8x128xf32>
    %96 = vector.extract_strided_slice %94 {offsets = [0, 128], sizes = [8, 128], strides = [1, 1]} : vector<8x256xf32> to vector<8x128xf32>
    %97 = vector.extract_strided_slice %85 {offsets = [0, 256], sizes = [8, 128], strides = [1, 1]} : vector<8x384xf32> to vector<8x128xf32>
    %98 = vector.extract_strided_slice %86 {offsets = [0, 256], sizes = [8, 128], strides = [1, 1]} : vector<8x384xf32> to vector<8x128xf32>
    %99 = vector.broadcast %8 : vector<1x128xf32> to vector<8x128xf32>
    %100 = arith.addf %98, %99 : vector<8x128xf32>
    %101 = arith.mulf %95, %100 : vector<8x128xf32>
    %102 = arith.addf %97, %101 : vector<8x128xf32>
    %103 = math.tanh %102 : vector<8x128xf32>
    %cst_34 = arith.constant 1.000000e+00 : f32
    %104 = vector.broadcast %cst_34 : f32 to vector<8x128xf32>
    %105 = arith.subf %104, %96 : vector<8x128xf32>
    %106 = arith.mulf %105, %103 : vector<8x128xf32>
    %107 = arith.mulf %96, %83 : vector<8x128xf32>
    %108 = arith.addf %106, %107 : vector<8x128xf32>
    %c24_35 = arith.constant 24 : index
    %c0_36 = arith.constant 0 : index
    %109 = vector.load %arg5[%c24_35, %c0_36] : memref<64x128xf32, #tpu.memory_space<vmem>>, vector<8x128xf32>
    tpu.vector_store %arg5[%c24_35, %c0_36], %108 {strides = array<i32>} : memref<64x128xf32, #tpu.memory_space<vmem>>, vector<8x128xf32>,
    %c32 = arith.constant 32 : index
    %c0_37 = arith.constant 0 : index
    %110 = vector.load %arg6[%c32, %c0_37] : memref<64x384xf32, #tpu.memory_space<vmem>>, vector<8x384xf32>
    %cst_38 = arith.constant dense<0.000000e+00> : vector<8x384xf32>
    %111 = tpu.matmul %108, %7, %cst_38 {dimension_numbers = #tpu.dot_dimension_numbers<[1], [0], [0], [1], [0, 0, 1, 1], [], []>} : vector<8x128xf32>, vector<128x384xf32>, vector<8x384xf32> -> vector<8x384xf32>
    %112 = vector.extract_strided_slice %110 {offsets = [0, 0], sizes = [8, 256], strides = [1, 1]} : vector<8x384xf32> to vector<8x256xf32>
    %113 = vector.extract_strided_slice %111 {offsets = [0, 0], sizes = [8, 256], strides = [1, 1]} : vector<8x384xf32> to vector<8x256xf32>
    %114 = arith.addf %112, %113 : vector<8x256xf32>
    %115 = arith.negf %114 : vector<8x256xf32>
    %116 = math.exp %115 : vector<8x256xf32>
    %cst_39 = arith.constant 1.000000e+00 : f32
    %117 = vector.broadcast %cst_39 : f32 to vector<8x256xf32>
    %118 = arith.addf %117, %116 : vector<8x256xf32>
    %119 = arith.divf %117, %118 : vector<8x256xf32>
    %120 = vector.extract_strided_slice %119 {offsets = [0, 0], sizes = [8, 128], strides = [1, 1]} : vector<8x256xf32> to vector<8x128xf32>
    %121 = vector.extract_strided_slice %119 {offsets = [0, 128], sizes = [8, 128], strides = [1, 1]} : vector<8x256xf32> to vector<8x128xf32>
    %122 = vector.extract_strided_slice %110 {offsets = [0, 256], sizes = [8, 128], strides = [1, 1]} : vector<8x384xf32> to vector<8x128xf32>
    %123 = vector.extract_strided_slice %111 {offsets = [0, 256], sizes = [8, 128], strides = [1, 1]} : vector<8x384xf32> to vector<8x128xf32>
    %124 = vector.broadcast %8 : vector<1x128xf32> to vector<8x128xf32>
    %125 = arith.addf %123, %124 : vector<8x128xf32>
    %126 = arith.mulf %120, %125 : vector<8x128xf32>
    %127 = arith.addf %122, %126 : vector<8x128xf32>
    %128 = math.tanh %127 : vector<8x128xf32>
    %cst_40 = arith.constant 1.000000e+00 : f32
    %129 = vector.broadcast %cst_40 : f32 to vector<8x128xf32>
    %130 = arith.subf %129, %121 : vector<8x128xf32>
    %131 = arith.mulf %130, %128 : vector<8x128xf32>
    %132 = arith.mulf %121, %108 : vector<8x128xf32>
    %133 = arith.addf %131, %132 : vector<8x128xf32>
    %c32_41 = arith.constant 32 : index
    %c0_42 = arith.constant 0 : index
    %134 = vector.load %arg5[%c32_41, %c0_42] : memref<64x128xf32, #tpu.memory_space<vmem>>, vector<8x128xf32>
    tpu.vector_store %arg5[%c32_41, %c0_42], %133 {strides = array<i32>} : memref<64x128xf32, #tpu.memory_space<vmem>>, vector<8x128xf32>,
    %c40 = arith.constant 40 : index
    %c0_43 = arith.constant 0 : index
    %135 = vector.load %arg6[%c40, %c0_43] : memref<64x384xf32, #tpu.memory_space<vmem>>, vector<8x384xf32>
    %cst_44 = arith.constant dense<0.000000e+00> : vector<8x384xf32>
    %136 = tpu.matmul %133, %7, %cst_44 {dimension_numbers = #tpu.dot_dimension_numbers<[1], [0], [0], [1], [0, 0, 1, 1], [], []>} : vector<8x128xf32>, vector<128x384xf32>, vector<8x384xf32> -> vector<8x384xf32>
    %137 = vector.extract_strided_slice %135 {offsets = [0, 0], sizes = [8, 256], strides = [1, 1]} : vector<8x384xf32> to vector<8x256xf32>
    %138 = vector.extract_strided_slice %136 {offsets = [0, 0], sizes = [8, 256], strides = [1, 1]} : vector<8x384xf32> to vector<8x256xf32>
    %139 = arith.addf %137, %138 : vector<8x256xf32>
    %140 = arith.negf %139 : vector<8x256xf32>
    %141 = math.exp %140 : vector<8x256xf32>
    %cst_45 = arith.constant 1.000000e+00 : f32
    %142 = vector.broadcast %cst_45 : f32 to vector<8x256xf32>
    %143 = arith.addf %142, %141 : vector<8x256xf32>
    %144 = arith.divf %142, %143 : vector<8x256xf32>
    %145 = vector.extract_strided_slice %144 {offsets = [0, 0], sizes = [8, 128], strides = [1, 1]} : vector<8x256xf32> to vector<8x128xf32>
    %146 = vector.extract_strided_slice %144 {offsets = [0, 128], sizes = [8, 128], strides = [1, 1]} : vector<8x256xf32> to vector<8x128xf32>
    %147 = vector.extract_strided_slice %135 {offsets = [0, 256], sizes = [8, 128], strides = [1, 1]} : vector<8x384xf32> to vector<8x128xf32>
    %148 = vector.extract_strided_slice %136 {offsets = [0, 256], sizes = [8, 128], strides = [1, 1]} : vector<8x384xf32> to vector<8x128xf32>
    %149 = vector.broadcast %8 : vector<1x128xf32> to vector<8x128xf32>
    %150 = arith.addf %148, %149 : vector<8x128xf32>
    %151 = arith.mulf %145, %150 : vector<8x128xf32>
    %152 = arith.addf %147, %151 : vector<8x128xf32>
    %153 = math.tanh %152 : vector<8x128xf32>
    %cst_46 = arith.constant 1.000000e+00 : f32
    %154 = vector.broadcast %cst_46 : f32 to vector<8x128xf32>
    %155 = arith.subf %154, %146 : vector<8x128xf32>
    %156 = arith.mulf %155, %153 : vector<8x128xf32>
    %157 = arith.mulf %146, %133 : vector<8x128xf32>
    %158 = arith.addf %156, %157 : vector<8x128xf32>
    %c40_47 = arith.constant 40 : index
    %c0_48 = arith.constant 0 : index
    %159 = vector.load %arg5[%c40_47, %c0_48] : memref<64x128xf32, #tpu.memory_space<vmem>>, vector<8x128xf32>
    tpu.vector_store %arg5[%c40_47, %c0_48], %158 {strides = array<i32>} : memref<64x128xf32, #tpu.memory_space<vmem>>, vector<8x128xf32>,
    %c48 = arith.constant 48 : index
    %c0_49 = arith.constant 0 : index
    %160 = vector.load %arg6[%c48, %c0_49] : memref<64x384xf32, #tpu.memory_space<vmem>>, vector<8x384xf32>
    %cst_50 = arith.constant dense<0.000000e+00> : vector<8x384xf32>
    %161 = tpu.matmul %158, %7, %cst_50 {dimension_numbers = #tpu.dot_dimension_numbers<[1], [0], [0], [1], [0, 0, 1, 1], [], []>} : vector<8x128xf32>, vector<128x384xf32>, vector<8x384xf32> -> vector<8x384xf32>
    %162 = vector.extract_strided_slice %160 {offsets = [0, 0], sizes = [8, 256], strides = [1, 1]} : vector<8x384xf32> to vector<8x256xf32>
    %163 = vector.extract_strided_slice %161 {offsets = [0, 0], sizes = [8, 256], strides = [1, 1]} : vector<8x384xf32> to vector<8x256xf32>
    %164 = arith.addf %162, %163 : vector<8x256xf32>
    %165 = arith.negf %164 : vector<8x256xf32>
    %166 = math.exp %165 : vector<8x256xf32>
    %cst_51 = arith.constant 1.000000e+00 : f32
    %167 = vector.broadcast %cst_51 : f32 to vector<8x256xf32>
    %168 = arith.addf %167, %166 : vector<8x256xf32>
    %169 = arith.divf %167, %168 : vector<8x256xf32>
    %170 = vector.extract_strided_slice %169 {offsets = [0, 0], sizes = [8, 128], strides = [1, 1]} : vector<8x256xf32> to vector<8x128xf32>
    %171 = vector.extract_strided_slice %169 {offsets = [0, 128], sizes = [8, 128], strides = [1, 1]} : vector<8x256xf32> to vector<8x128xf32>
    %172 = vector.extract_strided_slice %160 {offsets = [0, 256], sizes = [8, 128], strides = [1, 1]} : vector<8x384xf32> to vector<8x128xf32>
    %173 = vector.extract_strided_slice %161 {offsets = [0, 256], sizes = [8, 128], strides = [1, 1]} : vector<8x384xf32> to vector<8x128xf32>
    %174 = vector.broadcast %8 : vector<1x128xf32> to vector<8x128xf32>
    %175 = arith.addf %173, %174 : vector<8x128xf32>
    %176 = arith.mulf %170, %175 : vector<8x128xf32>
    %177 = arith.addf %172, %176 : vector<8x128xf32>
    %178 = math.tanh %177 : vector<8x128xf32>
    %cst_52 = arith.constant 1.000000e+00 : f32
    %179 = vector.broadcast %cst_52 : f32 to vector<8x128xf32>
    %180 = arith.subf %179, %171 : vector<8x128xf32>
    %181 = arith.mulf %180, %178 : vector<8x128xf32>
    %182 = arith.mulf %171, %158 : vector<8x128xf32>
    %183 = arith.addf %181, %182 : vector<8x128xf32>
    %c48_53 = arith.constant 48 : index
    %c0_54 = arith.constant 0 : index
    %184 = vector.load %arg5[%c48_53, %c0_54] : memref<64x128xf32, #tpu.memory_space<vmem>>, vector<8x128xf32>
    tpu.vector_store %arg5[%c48_53, %c0_54], %183 {strides = array<i32>} : memref<64x128xf32, #tpu.memory_space<vmem>>, vector<8x128xf32>,
    %c56 = arith.constant 56 : index
    %c0_55 = arith.constant 0 : index
    %185 = vector.load %arg6[%c56, %c0_55] : memref<64x384xf32, #tpu.memory_space<vmem>>, vector<8x384xf32>
    %cst_56 = arith.constant dense<0.000000e+00> : vector<8x384xf32>
    %186 = tpu.matmul %183, %7, %cst_56 {dimension_numbers = #tpu.dot_dimension_numbers<[1], [0], [0], [1], [0, 0, 1, 1], [], []>} : vector<8x128xf32>, vector<128x384xf32>, vector<8x384xf32> -> vector<8x384xf32>
    %187 = vector.extract_strided_slice %185 {offsets = [0, 0], sizes = [8, 256], strides = [1, 1]} : vector<8x384xf32> to vector<8x256xf32>
    %188 = vector.extract_strided_slice %186 {offsets = [0, 0], sizes = [8, 256], strides = [1, 1]} : vector<8x384xf32> to vector<8x256xf32>
    %189 = arith.addf %187, %188 : vector<8x256xf32>
    %190 = arith.negf %189 : vector<8x256xf32>
    %191 = math.exp %190 : vector<8x256xf32>
    %cst_57 = arith.constant 1.000000e+00 : f32
    %192 = vector.broadcast %cst_57 : f32 to vector<8x256xf32>
    %193 = arith.addf %192, %191 : vector<8x256xf32>
    %194 = arith.divf %192, %193 : vector<8x256xf32>
    %195 = vector.extract_strided_slice %194 {offsets = [0, 0], sizes = [8, 128], strides = [1, 1]} : vector<8x256xf32> to vector<8x128xf32>
    %196 = vector.extract_strided_slice %194 {offsets = [0, 128], sizes = [8, 128], strides = [1, 1]} : vector<8x256xf32> to vector<8x128xf32>
    %197 = vector.extract_strided_slice %185 {offsets = [0, 256], sizes = [8, 128], strides = [1, 1]} : vector<8x384xf32> to vector<8x128xf32>
    %198 = vector.extract_strided_slice %186 {offsets = [0, 256], sizes = [8, 128], strides = [1, 1]} : vector<8x384xf32> to vector<8x128xf32>
    %199 = vector.broadcast %8 : vector<1x128xf32> to vector<8x128xf32>
    %200 = arith.addf %198, %199 : vector<8x128xf32>
    %201 = arith.mulf %195, %200 : vector<8x128xf32>
    %202 = arith.addf %197, %201 : vector<8x128xf32>
    %203 = math.tanh %202 : vector<8x128xf32>
    %cst_58 = arith.constant 1.000000e+00 : f32
    %204 = vector.broadcast %cst_58 : f32 to vector<8x128xf32>
    %205 = arith.subf %204, %196 : vector<8x128xf32>
    %206 = arith.mulf %205, %203 : vector<8x128xf32>
    %207 = arith.mulf %196, %183 : vector<8x128xf32>
    %208 = arith.addf %206, %207 : vector<8x128xf32>
    %c56_59 = arith.constant 56 : index
    %c0_60 = arith.constant 0 : index
    %209 = vector.load %arg5[%c56_59, %c0_60] : memref<64x128xf32, #tpu.memory_space<vmem>>, vector<8x128xf32>
    tpu.vector_store %arg5[%c56_59, %c0_60], %208 {strides = array<i32>} : memref<64x128xf32, #tpu.memory_space<vmem>>, vector<8x128xf32>,
    return
  }
}

</mosaic_0001>

<bundles_post_ra>
// kernel: encoder_rnn_forward.1
= control target key start
LH: loop header
LB: loop body
LE: loop exit
PB: predicated region body
PF: predicated region fallthrough
CT: control target
= control target key end

     0   :  { %vm48_vm0 = vcmask 261120   ;;  %v1351_v47 = vmov 0.0   ;;  %s2482_s3 = inlined_call_operand.vmem [shape: f32[128,384], index: 3, kind: input, shape index: {}]   ;;  %s2483_s1 = inlined_call_operand.vmem [shape: f32[32,384], index: 1, kind: input, shape index: {}]   ;;  %s2484_s0 = inlined_call_operand.vmem [shape: f32[64,32], index: 0, kind: input, shape index: {}]   ;;  %s2485_s4 = inlined_call_operand.vmem [shape: f32[1,128], index: 4, kind: input, shape index: {}]   ;;  %s2486_s2 = inlined_call_operand.vmem [shape: f32[1,384], index: 2, kind: input, shape index: {}]   ;;  %s2487_s5 = inlined_call_operand.vmem [shape: f32[64,128], index: 5, kind: output, shape index: {}]  }
   0x1   :  { %v1385_v0 = vld [vmem:[%s2482_s3 + $0x168] sm:$0xff]  ;;  %v1393_v2 = vld [vmem:[%s2482_s3 + $0x150] sm:$0xff]  ;;  %v1402_v4 = vld [vmem:[%s2482_s3 + $0x138] sm:$0xff] }
   0x2   :  { %v37_v1 = vld [vmem:[%s2483_s1 + $0x48] sm:$0xff]  ;;  %272 = vmatpush.msra.mxu3 %v1385_v0  ;;  %v34_v3 = vld [vmem:[%s2483_s1 + $0x30] sm:$0xff]  ;;  %v31_v5 = vld [vmem:[%s2483_s1 + $0x18] sm:$0xff] }
   0x3   :  { %85 = vmatpush.msra.mxu0 %v37_v1  ;;  %1212 = vmatpush.msra.mxu2 %v37_v1  ;;  %v1411_v6 = vld [vmem:[%s2482_s3 + $0x120] sm:$0xff]  ;;  %v1425_v9 = vld [vmem:[%s2482_s3 + $0x108] sm:$0xff]  ;;  %v1433_v10 = vld [vmem:[%s2482_s3 + $0xf0] sm:$0xff] }
   0x4   :  { %273 = vmatpush.msra.mxu3 %v1393_v2  ;;  %v28_v7 = vld [vmem:[%s2483_s1] sm:$0xff]  ;;  %v1438_v11 = vld [vmem:[%s2482_s3 + $0x178] sm:$0xff]  ;;  %v1455_v14 = vld [vmem:[%s2482_s3 + $0x148] sm:$0xff] }
   0x5   :  { %86 = vmatpush.msra.mxu0 %v34_v3  ;;  %1213 = vmatpush.msra.mxu2 %v34_v3  ;;  %v1420_v8 = vld [vmem:[%s2484_s0] sm:$0xff]  ;;  %v1450_v13 = vld [vmem:[%s2482_s3 + $0xd8] sm:$0xff]  ;;  %v1467_v16 = vld [vmem:[%s2482_s3 + $0x130] sm:$0xff] }
   0x6   :  { %274 = vmatpush.msra.mxu3 %v1402_v4  ;;  %v1445_v12 = vld [vmem:[%s2482_s3 + $0x160] sm:$0xff]  ;;  %v1473_v17 = vld [vmem:[%s2484_s0 + $0x8] sm:$0xff]  ;;  %v1479_v18 = vld [vmem:[%s2484_s0 + $0x38] sm:$0xff] }
   0x7   :  { %87 = vmatpush.msra.mxu0 %v31_v5  ;;  %1214 = vmatpush.msra.mxu2 %v31_v5  ;;  %v1462_v15 = vld [vmem:[%s2482_s3 + $0xc0] sm:$0xff]  ;;  %v1484_v19 = vld [vmem:[%s2482_s3 + $0xa8] sm:$0xff]  ;;  %v1489_v20 = vld [vmem:[%s2482_s3 + $0x118] sm:$0xff] }
   0x8   :  { %275 = vmatpush.msra.mxu3 %v1411_v6  ;;  %v38_v21 = vld [vmem:[%s2483_s1 + $0x50] sm:$0xff]  ;;  %v1508_v23 = vld [vmem:[%s2482_s3 + $0x100] sm:$0xff]  ;;  %v35_v24 = vld [vmem:[%s2483_s1 + $0x38] sm:$0xff] }
   0x9   :  { %88 = vmatpush.msra.mxu0 %v28_v7  ;;  %1215 = vmatpush.msra.mxu2 %v28_v7  ;;  %v1503_v22 = vld [vmem:[%s2482_s3 + $0x90] sm:$0xff]  ;;  %v1518_v25 = vld [vmem:[%s2482_s3 + $0x78] sm:$0xff]  ;;  %v1523_v26 = vld [vmem:[%s2482_s3 + $0xe8] sm:$0xff] }
   0xa   :  { %1172 = vmatmul.msk.f32.vlgmr.msra.gmra.mxu0 %vm48_vm0, %v1420_v8  ;;  %276 = vmatpush.msra.mxu3 %v1425_v9  ;;  %v32_v27 = vld [vmem:[%s2483_s1 + $0x20] sm:$0xff]  ;;  %v1538_v29 = vld [vmem:[%s2482_s3 + $0xd0] sm:$0xff]  ;;  %v29_v31 = vld [vmem:[%s2483_s1 + $0x8] sm:$0xff] }
   0xb   :  { %312 = vmatpush.msrb.mxu0 %v1438_v11  ;;  %1179 = vmatmul.msk.f32.vlgmr.msra.gmra.mxu2 %vm48_vm0, %v1479_v18  ;;  %v1533_v28 = vld [vmem:[%s2482_s3 + $0x60] sm:$0xff]  ;;  %v1544_v30 = vld [vmem:[%s2484_s0 + $0x10] sm:$0xff]  ;;  %v1553_v32 = vld [vmem:[%s2482_s3 + $0x48] sm:$0xff] }
   0xc   :  { %277 = vmatpush.msra.mxu3 %v1433_v10  ;;  %1216 = vmatpush.msrb.mxu2 %v38_v21  ;;  %v1558_v33 = vld [vmem:[%s2482_s3 + $0xb8] sm:$0xff]  ;;  %v1570_v35 = vld [vmem:[%s2482_s3 + $0x30] sm:$0xff]  ;;  %v1575_v36 = vld [vmem:[%s2482_s3 + $0xa0] sm:$0xff] }
   0xd   :  { %313 = vmatpush.msrb.mxu0 %v1445_v12  ;;  %126 = vmatpush.msra.mxu1 %v38_v21  ;;  %v39_v34 = vld [vmem:[%s2483_s1 + $0x58] sm:$0xff]  ;;  %2508 = vst [vmem:[#allocation3_spill] sm:$0xff] %v1570_v35  ;;  %v36_v37 = vld [vmem:[%s2483_s1 + $0x40] sm:$0xff]  ;;  %v1592_v39 = vld [vmem:[%s2482_s3 + $0x88] sm:$0xff] }
   0xe   :  { %278 = vmatpush.msra.mxu3 %v1450_v13  ;;  %1217 = vmatpush.msrb.mxu2 %v35_v24  ;;  %v1587_v38 = vld [vmem:[%s2482_s3 + $0x18] sm:$0xff]  ;;  %v33_v40 = vld [vmem:[%s2483_s1 + $0x28] sm:$0xff]  ;;  %v1602_v41 = vld [vmem:[%s2482_s3] sm:$0xff] }
   0xf   :  { %314 = vmatpush.msrb.mxu0 %v1455_v14  ;;  %127 = vmatpush.msra.mxu1 %v35_v24  ;;  %2509 = vst [vmem:[#allocation4_spill] sm:$0xff] %v1587_v38  ;;  %v1607_v42 = vld [vmem:[%s2482_s3 + $0x70] sm:$0xff]  ;;  %v1615_v43 = vld [vmem:[%s2484_s0 + $0x18] sm:$0xff]  ;;  %v1645_v49 = vld [vmem:[%s2482_s3 + $0x40] sm:$0xff] }
  0x10   :  { %279 = vmatpush.msra.mxu3 %v1462_v15  ;;  %1218 = vmatpush.msrb.mxu2 %v32_v27  ;;  %2510 = vst [vmem:[#allocation5_spill] sm:$0xff] %v1602_v41  ;;  %v1621_v44 = vld [vmem:[%s2482_s3 + $0x170] sm:$0xff]  ;;  %v1626_v45 = vld [vmem:[%s2482_s3 + $0x58] sm:$0xff]  ;;  %v1652_v50 = vld [vmem:[%s2482_s3 + $0x140] sm:$0xff] }
  0x11   :  { %315 = vmatpush.msrb.mxu0 %v1467_v16  ;;  %128 = vmatpush.msra.mxu1 %v32_v27  ;;  %v30_v46 = vld [vmem:[%s2483_s1 + $0x10] sm:$0xff]  ;;  %v1640_v48 = vld [vmem:[%s2482_s3 + $0x158] sm:$0xff]  ;;  %2511 = vst [vmem:[#allocation6_spill] sm:$0xff] %v1645_v49  ;;  %v1657_v51 = vld [vmem:[%s2482_s3 + $0x28] sm:$0xff] }
  0x12   :  { %1173 = vmatmul.msk.f32.gmra.mxu0 %vm48_vm0, %v1473_v17  ;;  %280 = vmatpush.msra.mxu3 %v1484_v19  ;;  %2512 = vst [vmem:[#allocation7_spill] sm:$0xff] %v1657_v51  ;;  %v1665_v52 = vld [vmem:[%s2482_s3 + $0x128] sm:$0xff]  ;;  %v1672_v53 = vld [vmem:[%s2482_s3 + $0x10] sm:$0xff]  ;;  %v1679_v54 = vld [vmem:[%s2484_s0 + $0x20] sm:$0xff] }
  0x13   :  { %316 = vmatpush.msrb.mxu0 %v1489_v20  ;;  %1219 = vmatpush.msrb.mxu2 %v29_v31  ;;  %2513 = vst [vmem:[#allocation8_spill] sm:$0xff] %v1672_v53  ;;  %v1685_v55 = vld [vmem:[%s2482_s3 + $0x110] sm:$0xff]  ;;  %v1697_v56 = vld [vmem:[%s2482_s3 + $0xf8] sm:$0xff]  ;;  %v1705_v57 = vld [vmem:[%s2482_s3 + $0xe0] sm:$0xff] }
  0x14   :  { %281 = vmatpush.msra.mxu3 %v1503_v22  ;;  %1187 = vmatmul.msk.f32.vlgmr.msrb.gmra.mxu2 %vm48_vm0, %v1479_v18  ;;  %v1714_v58 = vld [vmem:[%s2482_s3 + $0xc8] sm:$0xff]  ;;  %v1729_v60 = vld [vmem:[%s2482_s3 + $0xb0] sm:$0xff]  ;;  %v1741_v61 = vld [vmem:[%s2482_s3 + $0x98] sm:$0xff] }
  0x15   :  { %317 = vmatpush.msrb.mxu0 %v1508_v23  ;;  %167 = vmatpush.msra.mxu2 %v39_v34  ;;  %v1723_v59 = vld [vmem:[%s2484_s0 + $0x28] sm:$0xff]  ;;  %v1749_v62 = vld [vmem:[%s2482_s3 + $0x80] sm:$0xff]  ;;  %v1767_v1 = vld [vmem:[%s2484_s0 + $0x30] sm:$0xff] }
  0x16   :  { %282 = vmatpush.msra.mxu3 %v1518_v25  ;;  %129 = vmatpush.msra.mxu1 %v29_v31  ;;  %v1758_v63 = vld [vmem:[%s2482_s3 + $0x68] sm:$0xff]  ;;  %v1773_v3 = vld [vmem:[%s2482_s3 + $0x50] sm:$0xff]  ;;  %v1785_v5 = vld [vmem:[%s2482_s3 + $0x38] sm:$0xff] }
  0x17   :  { %318 = vmatpush.msrb.mxu0 %v1523_v26  ;;  %168 = vmatpush.msra.mxu2 %v36_v37  ;;  %2514 = vst [vmem:[#allocation9_spill] sm:$0xff] %v1773_v3  ;;  %v1793_v7 = vld [vmem:[%s2482_s3 + $0x20] sm:$0xff] }
  0x18   :  { %283 = vmatpush.msra.mxu3 %v1533_v28  ;;  %1180 = vmatmul.msk.f32.vlgmr.msra.gmra.mxu1 %vm48_vm0, %v1420_v8  ;;  %2515 = vst [vmem:[#allocation10_spill] sm:$0xff] %v1785_v5 }
  0x19   :  { %319 = vmatpush.msrb.mxu0 %v1538_v29  ;;  %169 = vmatpush.msra.mxu2 %v33_v40  ;;  %2516 = vst [vmem:[#allocation11_spill] sm:$0xff] %v1793_v7 }
  0x1a   :  { %1174 = vmatmul.msk.f32.gmra.mxu0 %vm48_vm0, %v1544_v30  ;;  %284 = vmatpush.msra.mxu3 %v1553_v32 }
  0x1b   :  { %320 = vmatpush.msrb.mxu0 %v1558_v33  ;;  %387 = vmatpush.msrb.mxu1 %v1385_v0 }
  0x1c   :  { %285 = vmatpush.msra.mxu3 %v1570_v35  ;;  %170 = vmatpush.msra.mxu2 %v30_v46 }
  0x1d   :  { %321 = vmatpush.msrb.mxu0 %v1575_v36  ;;  %388 = vmatpush.msrb.mxu1 %v1393_v2 }
  0x1e   :  { %286 = vmatpush.msra.mxu3 %v1587_v38  ;;  %1188 = vmatmul.msk.f32.vlgmr.msra.gmra.mxu2 %vm48_vm0, %v1420_v8  ;;  %v1802_v8 = vld [vmem:[%s2482_s3 + $0x8] sm:$0xff] }
  0x1f   :  { %322 = vmatpush.msrb.mxu0 %v1592_v39  ;;  %389 = vmatpush.msrb.mxu1 %v1402_v4  ;;  %2517 = vst [vmem:[#allocation12_spill] sm:$0xff] %v1802_v8 }
  0x20   :  { %287 = vmatpush.msra.mxu3 %v1602_v41  ;;  %407 = vmatpush.msrb.mxu2 %v1621_v44 }
  0x21   :  { %323 = vmatpush.msrb.mxu0 %v1607_v42  ;;  %288 = vmatmul.f32.vlgmr.msra.gmra.mxu3 %v1351_v47 }
  0x22   :  { %1175 = vmatmul.msk.f32.gmra.mxu0 %vm48_vm0, %v1615_v43  ;;  %292 = vmatpush.msrb.mxu3 %v1621_v44 }
  0x23   :  { %324 = vmatpush.msrb.mxu0 %v1626_v45  ;;  %1181 = vmatmul.msk.f32.gmra.mxu1 %vm48_vm0, %v1473_v17 }
  0x24   :  { %293 = vmatpush.msrb.mxu3 %v1640_v48  ;;  %408 = vmatpush.msrb.mxu2 %v1640_v48 }
  0x25   :  { %325 = vmatpush.msrb.mxu0 %v1645_v49  ;;  %390 = vmatpush.msrb.mxu1 %v1411_v6 }
  0x26   :  { %294 = vmatpush.msrb.mxu3 %v1652_v50  ;;  %409 = vmatpush.msrb.mxu2 %v1652_v50 }
  0x27   :  { %326 = vmatpush.msrb.mxu0 %v1657_v51  ;;  %391 = vmatpush.msrb.mxu1 %v1425_v9 }
  0x28   :  { %295 = vmatpush.msrb.mxu3 %v1665_v52  ;;  %1189 = vmatmul.msk.f32.gmra.mxu2 %vm48_vm0, %v1473_v17 }
  0x29   :  { %327 = vmatpush.msrb.mxu0 %v1672_v53  ;;  %410 = vmatpush.msrb.mxu2 %v1665_v52 }
  0x2a   :  { %1176 = vmatmul.msk.f32.gmra.mxu0 %vm48_vm0, %v1679_v54  ;;  %296 = vmatpush.msrb.mxu3 %v1685_v55 }
  0x2b   :  { %499 = vmatpush.msra.mxu0 %v1385_v0  ;;  %1182 = vmatmul.msk.f32.gmra.mxu1 %vm48_vm0, %v1544_v30 }
  0x2c   :  { %297 = vmatpush.msrb.mxu3 %v1697_v56  ;;  %411 = vmatpush.msrb.mxu2 %v1685_v55 }
  0x2d   :  { %500 = vmatpush.msra.mxu0 %v1393_v2  ;;  %392 = vmatpush.msrb.mxu1 %v1433_v10 }
  0x2e   :  { %298 = vmatpush.msrb.mxu3 %v1705_v57  ;;  %412 = vmatpush.msrb.mxu2 %v1697_v56 }
  0x2f   :  { %501 = vmatpush.msra.mxu0 %v1402_v4  ;;  %393 = vmatpush.msrb.mxu1 %v1450_v13 }
  0x30   :  { %299 = vmatpush.msrb.mxu3 %v1714_v58  ;;  %413 = vmatpush.msrb.mxu2 %v1705_v57 }
  0x31   :  { %502 = vmatpush.msra.mxu0 %v1411_v6  ;;  %1190 = vmatmul.msk.f32.gmra.mxu2 %vm48_vm0, %v1544_v30 }
  0x32   :  { %1177 = vmatmul.msk.f32.gmra.mxu0 %vm48_vm0, %v1723_v59  ;;  %300 = vmatpush.msrb.mxu3 %v1729_v60 }
  0x33   :  { %394 = vmatpush.msrb.mxu1 %v1462_v15  ;;  %414 = vmatpush.msrb.mxu2 %v1714_v58 }
  0x34   :  { %301 = vmatpush.msrb.mxu3 %v1741_v61  ;;  %1183 = vmatmul.msk.f32.gmra.mxu1 %vm48_vm0, %v1615_v43 }
  0x35   :  { %503 = vmatpush.msra.mxu0 %v1425_v9  ;;  %415 = vmatpush.msrb.mxu2 %v1729_v60 }
  0x36   :  { %302 = vmatpush.msrb.mxu3 %v1749_v62  ;;  %395 = vmatpush.msrb.mxu1 %v1484_v19 }
  0x37   :  { %416 = vmatpush.msrb.mxu2 %v1741_v61  ;;  %504 = vmatpush.msra.mxu0 %v1433_v10 }
  0x38   :  { %303 = vmatpush.msrb.mxu3 %v1758_v63  ;;  %396 = vmatpush.msrb.mxu1 %v1503_v22 }
  0x39   :  { %417 = vmatpush.msrb.mxu2 %v1749_v62  ;;  %505 = vmatpush.msra.mxu0 %v1450_v13 }
  0x3a   :  { %1178 = vmatmul.msk.f32.gmra.mxu0 %vm48_vm0, %v1767_v1  ;;  %304 = vmatpush.msrb.mxu3 %v1773_v3 }
  0x3b   :  { %1191 = vmatmul.msk.f32.gmra.mxu2 %vm48_vm0, %v1615_v43  ;;  %397 = vmatpush.msrb.mxu1 %v1518_v25 }
  0x3c   :  { %305 = vmatpush.msrb.mxu3 %v1785_v5  ;;  %418 = vmatpush.msrb.mxu2 %v1758_v63 }
  0x3d   :  { %1184 = vmatmul.msk.f32.gmra.mxu1 %vm48_vm0, %v1679_v54  ;;  %506 = vmatpush.msra.mxu0 %v1462_v15 }
  0x3e   :  { %306 = vmatpush.msrb.mxu3 %v1793_v7  ;;  %398 = vmatpush.msrb.mxu1 %v1533_v28 }
  0x3f   :  { %419 = vmatpush.msrb.mxu2 %v1773_v3  ;;  %507 = vmatpush.msra.mxu0 %v1484_v19 }
  0x40   :  { %307 = vmatpush.msrb.mxu3 %v1802_v8  ;;  %399 = vmatpush.msrb.mxu1 %v1553_v32 }
  0x41   :  { %308 = vmatmul.f32.vlgmr.msrb.gmra.mxu3 %v1351_v47  ;;  %420 = vmatpush.msrb.mxu2 %v1785_v5 }
  0x42   :  { %328 = vmatmul.f32.vlgmr.msrb.gmra.mxu0 %v1351_v47  ;;  %427 = vmatpush.msra.mxu3 %v1438_v11 }
  0x43   :  { %400 = vmatpush.msrb.mxu1 %v1570_v35  ;;  %1192 = vmatmul.msk.f32.gmra.mxu2 %vm48_vm0, %v1679_v54 }
  0x44   :  { %428 = vmatpush.msra.mxu3 %v1445_v12  ;;  %508 = vmatpush.msra.mxu0 %v1503_v22 }
  0x45   :  { %1185 = vmatmul.msk.f32.gmra.mxu1 %vm48_vm0, %v1723_v59  ;;  %421 = vmatpush.msrb.mxu2 %v1793_v7 }
  0x46   :  { %429 = vmatpush.msra.mxu3 %v1455_v14  ;;  %401 = vmatpush.msrb.mxu1 %v1587_v38 }
  0x47   :  { %509 = vmatpush.msra.mxu0 %v1518_v25  ;;  %422 = vmatpush.msrb.mxu2 %v1802_v8 }
  0x48   :  { %430 = vmatpush.msra.mxu3 %v1467_v16  ;;  %402 = vmatpush.msrb.mxu1 %v1602_v41 }
  0x49   :  { %539 = vmatpush.msra.mxu2 %v1438_v11  ;;  %510 = vmatpush.msra.mxu0 %v1533_v28 }
  0x4a   :  { %431 = vmatpush.msra.mxu3 %v1489_v20  ;;  %519 = vmatpush.msra.mxu1 %v1621_v44 }
  0x4b   :  { %1193 = vmatmul.msk.f32.gmra.mxu2 %vm48_vm0, %v1723_v59  ;;  %511 = vmatpush.msra.mxu0 %v1553_v32 }
  0x4c   :  { %432 = vmatpush.msra.mxu3 %v1508_v23  ;;  %520 = vmatpush.msra.mxu1 %v1640_v48 }
  0x4d   :  { %540 = vmatpush.msra.mxu2 %v1445_v12  ;;  %1186 = vmatmul.msk.f32.gmra.mxu1 %vm48_vm0, %v1767_v1 }
  0x4e   :  { %433 = vmatpush.msra.mxu3 %v1523_v26  ;;  %521 = vmatpush.msra.mxu1 %v1652_v50 }
  0x4f   :  { %541 = vmatpush.msra.mxu2 %v1455_v14  ;;  %512 = vmatpush.msra.mxu0 %v1570_v35 }
  0x50   :  { %434 = vmatpush.msra.mxu3 %v1538_v29  ;;  %522 = vmatpush.msra.mxu1 %v1665_v52 }
  0x51   :  { %542 = vmatpush.msra.mxu2 %v1467_v16  ;;  %513 = vmatpush.msra.mxu0 %v1587_v38 }
  0x52   :  { %435 = vmatpush.msra.mxu3 %v1558_v33  ;;  %523 = vmatpush.msra.mxu1 %v1685_v55 }
  0x53   :  { %1194 = vmatmul.msk.f32.gmra.mxu2 %vm48_vm0, %v1767_v1  ;;  %514 = vmatpush.msra.mxu0 %v1602_v41 }
  0x54   :  { %436 = vmatpush.msra.mxu3 %v1575_v36  ;;  %543 = vmatpush.msra.mxu2 %v1489_v20 }
  0x55   :  { %524 = vmatpush.msra.mxu1 %v1697_v56  ;;  %631 = vmatpush.msrb.mxu0 %v1621_v44 }
  0x56   :  { %437 = vmatpush.msra.mxu3 %v1592_v39  ;;  %544 = vmatpush.msra.mxu2 %v1508_v23 }
  0x57   :  { %525 = vmatpush.msra.mxu1 %v1705_v57  ;;  %632 = vmatpush.msrb.mxu0 %v1640_v48 }
  0x58   :  { %438 = vmatpush.msra.mxu3 %v1607_v42  ;;  %545 = vmatpush.msra.mxu2 %v1523_v26 }
  0x59   :  { %526 = vmatpush.msra.mxu1 %v1714_v58  ;;  %633 = vmatpush.msrb.mxu0 %v1652_v50 }
  0x5a   :  { %439 = vmatpush.msra.mxu3 %v1626_v45  ;;  %546 = vmatpush.msra.mxu2 %v1538_v29 }
  0x5b   :  { %1195 = vmatmul.msk.f32.gmra.mxu2 %vm48_vm0, %v1479_v18  ;;  %527 = vmatpush.msra.mxu1 %v1729_v60  ;;  %v40_v18 = vld [vmem:[%s2486_s2] sm:$0x7] }
  0x5c   :  { %440 = vmatpush.msra.mxu3 %v1645_v49  ;;  %547 = vmatpush.msra.mxu2 %v1558_v33  ;;  %v42_v21 = vperm.slane %v40_v18, 0 }
  0x5d   :  { %528 = vmatpush.msra.mxu1 %v1741_v61  ;;  %634 = vmatpush.msrb.mxu0 %v1665_v52 }
  0x5e   :  { %441 = vmatpush.msra.mxu3 %v1657_v51  ;;  %548 = vmatpush.msra.mxu2 %v1575_v36 }
  0x5f   :  { %529 = vmatpush.msra.mxu1 %v1749_v62  ;;  %635 = vmatpush.msrb.mxu0 %v1685_v55 }
  0x60   :  { %442 = vmatpush.msra.mxu3 %v1672_v53  ;;  %549 = vmatpush.msra.mxu2 %v1592_v39 }
  0x61   :  { %530 = vmatpush.msra.mxu1 %v1758_v63  ;;  %636 = vmatpush.msrb.mxu0 %v1697_v56 }
  0x62   :  { %611 = vmatpush.msrb.mxu3 %v1385_v0  ;;  %550 = vmatpush.msra.mxu2 %v1607_v42 }
  0x63   :  { %531 = vmatpush.msra.mxu1 %v1773_v3  ;;  %637 = vmatpush.msrb.mxu0 %v1705_v57 }
  0x64   :  { %612 = vmatpush.msrb.mxu3 %v1393_v2  ;;  %551 = vmatpush.msra.mxu2 %v1626_v45 }
  0x65   :  { %532 = vmatpush.msra.mxu1 %v1785_v5  ;;  %638 = vmatpush.msrb.mxu0 %v1714_v58 }
  0x66   :  { %613 = vmatpush.msrb.mxu3 %v1402_v4  ;;  %552 = vmatpush.msra.mxu2 %v1645_v49 }
  0x67   :  { %533 = vmatpush.msra.mxu1 %v1793_v7  ;;  %639 = vmatpush.msrb.mxu0 %v1729_v60 }
  0x68   :  { %614 = vmatpush.msrb.mxu3 %v1411_v6  ;;  %553 = vmatpush.msra.mxu2 %v1657_v51 }
  0x69   :  { %534 = vmatpush.msra.mxu1 %v1802_v8  ;;  %640 = vmatpush.msrb.mxu0 %v1741_v61 }
  0x6a   :  { %615 = vmatpush.msrb.mxu3 %v1425_v9  ;;  %554 = vmatpush.msra.mxu2 %v1672_v53 }
  0x6b   :  { %641 = vmatpush.msrb.mxu0 %v1749_v62 }
  0x6c   :  { %616 = vmatpush.msrb.mxu3 %v1433_v10 }
  0x6d   :  { %642 = vmatpush.msrb.mxu0 %v1758_v63 }
  0x6e   :  { %617 = vmatpush.msrb.mxu3 %v1450_v13 }
  0x6f   :  { %643 = vmatpush.msrb.mxu0 %v1773_v3 }
  0x70   :  { %618 = vmatpush.msrb.mxu3 %v1462_v15 }
  0x71   :  { %644 = vmatpush.msrb.mxu0 %v1785_v5 }
  0x72   :  { %619 = vmatpush.msrb.mxu3 %v1484_v19 }
  0x73   :  { %645 = vmatpush.msrb.mxu0 %v1793_v7 }
  0x74   :  { %620 = vmatpush.msrb.mxu3 %v1503_v22 }
  0x75   :  { %646 = vmatpush.msrb.mxu0 %v1802_v8 }
  0x76   :  { %621 = vmatpush.msrb.mxu3 %v1518_v25 }
  0x78   :  { %622 = vmatpush.msrb.mxu3 %v1533_v28 }
  0x7a   :  { %623 = vmatpush.msrb.mxu3 %v1553_v32 }
  0x7c   :  { %624 = vmatpush.msrb.mxu3 %v1570_v35 }
  0x7e   :  { %625 = vmatpush.msrb.mxu3 %v1587_v38 }
  0x80   :  { %626 = vmatpush.msrb.mxu3 %v1602_v41 }
  0x87   :  { %v90_v17 = vpop.f32.mrf.mxu0 }
  0x88   :  { %v91_v46 = vadd.f32 %v90_v17, %v42_v21 }
  0x8e   :  { %v111_v30 = vpop.f32.mrf.mxu2 }
  0x8f   :  { %v93_v24 = vpop.f32.mrf.mxu0  ;;  %v1930_v31 = vadd.f32 %v111_v30, %v42_v21 }
  0x90   :  { %v1928_v27 = vadd.f32 %v93_v24, %v42_v21 }
  0x91   :  { %2519 = vst [vmem:[#allocation14_spill] sm:$0xff] %v1930_v31 }
  0x92   :  { %2518 = vst [vmem:[#allocation13_spill] sm:$0xff] %v1928_v27 }
  0x95   :  { %v131_v17 = vpop.f32.mrf.mxu1 }
  0x97   :  { %v96_v34 = vpop.f32.mrf.mxu0 }
  0x98   :  { %v1932_v37 = vadd.f32 %v96_v34, %v42_v21 }
  0x9a   :  { %2520 = vst [vmem:[#allocation15_spill] sm:$0xff] %v1932_v37 }
  0x9f   :  { %v99_v40 = vpop.f32.mrf.mxu0 }
  0xa0   :  { %v1934_v43 = vadd.f32 %v99_v40, %v42_v21  ;;  %v1942_v40 = vperm.slane %v40_v18, 1 }
  0xa2   :  { %2521 = vst [vmem:[#allocation16_spill] sm:$0xff] %v1934_v43 }
  0xa3   :  { %2525 = vst [vmem:[#allocation20_spill] sm:$0xff] %v1942_v40 }
  0xa4   :  { %v289_v47 = vpop.f32.mrf.mxu3 }
  0xa5   :  { %v332_v54 = vadd.f32 %v289_v47, %v91_v46  ;;  %v132_v46 = vadd.f32 %v131_v17, %v1942_v40 }
  0xa7   :  { %v102_v59 = vpop.f32.mrf.mxu0  ;;  %v1196_v1 = vmul.f32 -1.442695, %v332_v54 }
  0xa8   :  { %v1936_v8 = vadd.f32 %v102_v59, %v42_v21 }
  0xa9   :  { %1222 = vpow2.f32 %v1196_v1 }
  0xaa   :  { %2522 = vst [vmem:[#allocation17_spill] sm:$0xff] %v1936_v8 }
  0xaf   :  { %v105_v41 = vpop.f32.mrf.mxu0  ;;  %v1223_v27 = vpop.eup %1222 }
  0xb0   :  { %v1938_v24 = vadd.f32 %v105_v41, %v42_v21  ;;  %v340_v30 = vadd.f32 1.0, %v1223_v27  ;;  %v1945_v41 = vpop.f32.mrf.mxu2 }
  0xb1   :  { %2526 = vst [vmem:[#allocation21_spill] sm:$0xff] %v1945_v41 }
  0xb2   :  { %2523 = vst [vmem:[#allocation18_spill] sm:$0xff] %v1938_v24  ;;  %1224 = vrcp.f32 %v340_v30  ;;  %v353_v24 = vand.u32 2147483648, %v340_v30  ;;  %vm347_vm2 = vweird.f32 %v340_v30 }
  0xb7   :  { %v108_v31 = vpop.f32.mrf.mxu0 }
  0xb8   :  { %v1940_v34 = vadd.f32 %v108_v31, %v42_v21  ;;  %v1225_v37 = vpop.eup %1224  ;;  %v351_v21 = vand.u32 2147483647, %v340_v30  ;;  %v1950_v31 = vld [vmem:[%s2485_s4] ss:$0 sm:$0xff] }
  0xb9   :  { %v343_v43 = vmul.f32 %v1225_v37, %v340_v30  ;;  %vm348_vm1 = vweird.f32 %v1225_v37 }
  0xba   :  { %2524 = vst [vmem:[#allocation19_spill] sm:$0xff] %v1940_v34  ;;  %vm349_vm3 = vmor %vm347_vm2, %vm348_vm1  ;;  %vm352_vm4 = vcmp.eq.f32.partialorder %v351_v21, 8.507059e+37 }
  0xbb   :  { %v344_v47 = vsub.f32 1.0, %v343_v43 }
  0xbd   :  { %v345_v8 = vmul.f32 %v1225_v37, %v344_v47 }
  0xbf   :  { %v346_v27 = vadd.f32 %v1225_v37, %v345_v8  ;;  %v329_v17 = vpop.f32.mrf.mxu0 }
  0xc0   :  { %v375_v47 = vadd.f32 %v1950_v31, %v329_v17 }
  0xc1   :  { %v350_v43 = vsel %vm349_vm3, %v1225_v37, %v346_v27 }
  0xc4   :  { %v309_v54 = vpop.f32.mrf.mxu3 }
  0xc5   :  { %v333_v59 = vadd.f32 %v309_v54, %v132_v46  ;;  %v354_v54 = vor.u32 1.1754944e-38, %v353_v24 }
  0xc7   :  { %v1197_v1 = vmul.f32 -1.442695, %v333_v59  ;;  %v1953_v59 = vperm.slane %v40_v18, 2  ;;  %v355_v8 = vsel %vm352_vm4, %v354_v54, %v350_v43 }
  0xc8   :  { %v376_v30 = vmul.f32 %v375_v47, %v355_v8  ;;  %v134_v8 = vpop.f32.mrf.mxu1 }
  0xc9   :  { %1226 = vpow2.f32 %v1197_v1  ;;  %v172_v1 = vpop.f32.mrf.mxu2 }
  0xca   :  { %v173_v41 = vadd.f32 %v172_v1, %v1953_v59 }
  0xcc   :  { %v377_v7 = vadd.f32 %v376_v30, %v173_v41  ;;  %v2533_v41 = vld [vmem:[#allocation12_spill] sm:$0xff] }
  0xcf   :  { %v1227_v34 = vpop.eup %1226 }
  0xd0   :  { %v341_v46 = vadd.f32 1.0, %v1227_v34  ;;  %v2015_v30 = vpop.f32.mrf.mxu1 }
  0xd1   :  { %2535 = vst [vmem:[#allocation23_spill] sm:$0xff] %v2015_v30  ;;  %v2545_v30 = vld [vmem:[#allocation13_spill] sm:$0xff] }
  0xd2   :  { %1228 = vrcp.f32 %v341_v46  ;;  %v368_v51 = vand.u32 2147483648, %v341_v46  ;;  %v366_v37 = vand.u32 2147483647, %v341_v46  ;;  %vm362_vm6 = vweird.f32 %v341_v46 }
  0xd3   :  { %1230 = vtanh.f32 %v377_v7  ;;  %v2531_v7 = vld [vmem:[#allocation8_spill] sm:$0xff] }
  0xd4   :  { %v369_v18 = vor.u32 1.1754944e-38, %v368_v51  ;;  %vm367_vm8 = vcmp.eq.f32.partialorder %v366_v37, 8.507059e+37  ;;  %v2528_v51 = vld [vmem:[#allocation7_spill] sm:$0xff] }
  0xd8   :  { %v1229_v40 = vpop.eup %1228 }
  0xd9   :  { %v358_v53 = vmul.f32 %v1229_v40, %v341_v46  ;;  %vm363_vm5 = vweird.f32 %v1229_v40  ;;  %v1231_v17 = vpop.eup %1230  ;;  %v175_v46 = vpop.f32.mrf.mxu2 }
  0xda   :  { %vm364_vm7 = vmor %vm362_vm6, %vm363_vm5 }
  0xdb   :  { %v359_v38 = vsub.f32 1.0, %v358_v53  ;;  %v2529_v53 = vld [vmem:[#allocation4_spill] sm:$0xff] }
  0xdd   :  { %v360_v5 = vmul.f32 %v1229_v40, %v359_v38  ;;  %v2527_v38 = vld [vmem:[#allocation10_spill] sm:$0xff] }
  0xdf   :  { %v361_v24 = vadd.f32 %v1229_v40, %v360_v5  ;;  %v2530_v5 = vld [vmem:[#allocation11_spill] sm:$0xff] }
  0xe1   :  { %v365_v34 = vsel %vm364_vm7, %v1229_v40, %v361_v24  ;;  %v2532_v40 = vld [vmem:[#allocation5_spill] sm:$0xff]  ;;  %v2013_v1 = vpop.f32.mrf.mxu2  ;;  %v2019_v24 = vpop.f32.mrf.mxu1 }
  0xe2   :  { %v370_v27 = vsel %vm367_vm8, %v369_v18, %v365_v34  ;;  %2534 = vst [vmem:[#allocation22_spill] sm:$0xff] %v2013_v1 }
  0xe3   :  { %v379_v21 = vsub.f32 1.0, %v370_v27  ;;  %v381_v54 = vmul.f32 0.0, %v370_v27  ;;  %2537 = vst [vmem:[#allocation25_spill] sm:$0xff] %v2019_v24 }
  0xe5   :  { %v380_v43 = vmul.f32 %v1231_v17, %v379_v21 }
  0xe7   :  { %v1956_v47 = vadd.f32 %v381_v54, %v380_v43 }
  0xe9   :  { %383 = vst [vmem:[%s2487_s5] sm:$0xff] %v1956_v47  ;;  %403 = vmatmul.f32.vlgmr.msrb.gmra.mxu1 %v1956_v47  ;;  %423 = vmatmul.f32.vlgmr.msrb.gmra.mxu2 %v1956_v47  ;;  %v2017_v37 = vpop.f32.mrf.mxu2  ;;  %v2023_v34 = vpop.f32.mrf.mxu1 }
  0xea   :  { %443 = vmatmul.f32.vlgmr.msra.gmra.mxu3 %v1956_v47  ;;  %651 = vmatpush.msrb.mxu1 %v1438_v11  ;;  %2536 = vst [vmem:[#allocation24_spill] sm:$0xff] %v2017_v37 }
  0xeb   :  { %723 = vmatpush.msrb.mxu2 %v1385_v0  ;;  %743 = vmatpush.msra.mxu3 %v1621_v44  ;;  %2539 = vst [vmem:[#allocation27_spill] sm:$0xff] %v2023_v34 }
  0xec   :  { %652 = vmatpush.msrb.mxu1 %v1445_v12 }
  0xed   :  { %724 = vmatpush.msrb.mxu2 %v1393_v2  ;;  %744 = vmatpush.msra.mxu3 %v1640_v48 }
  0xee   :  { %653 = vmatpush.msrb.mxu1 %v1455_v14 }
  0xef   :  { %725 = vmatpush.msrb.mxu2 %v1402_v4  ;;  %745 = vmatpush.msra.mxu3 %v1652_v50 }
  0xf0   :  { %654 = vmatpush.msrb.mxu1 %v1467_v16 }
  0xf1   :  { %726 = vmatpush.msrb.mxu2 %v1411_v6  ;;  %746 = vmatpush.msra.mxu3 %v1665_v52  ;;  %v2021_v18 = vpop.f32.mrf.mxu2  ;;  %v2027_v21 = vpop.f32.mrf.mxu1 }
  0xf2   :  { %655 = vmatpush.msrb.mxu1 %v1489_v20  ;;  %2538 = vst [vmem:[#allocation26_spill] sm:$0xff] %v2021_v18 }
  0xf3   :  { %727 = vmatpush.msrb.mxu2 %v1425_v9  ;;  %747 = vmatpush.msra.mxu3 %v1685_v55  ;;  %2541 = vst [vmem:[#allocation29_spill] sm:$0xff] %v2027_v21 }
  0xf4   :  { %656 = vmatpush.msrb.mxu1 %v1508_v23 }
  0xf5   :  { %728 = vmatpush.msrb.mxu2 %v1433_v10  ;;  %748 = vmatpush.msra.mxu3 %v1697_v56 }
  0xf6   :  { %657 = vmatpush.msrb.mxu1 %v1523_v26 }
  0xf7   :  { %729 = vmatpush.msrb.mxu2 %v1450_v13  ;;  %749 = vmatpush.msra.mxu3 %v1705_v57 }
  0xf8   :  { %658 = vmatpush.msrb.mxu1 %v1538_v29 }
  0xf9   :  { %730 = vmatpush.msrb.mxu2 %v1462_v15  ;;  %750 = vmatpush.msra.mxu3 %v1714_v58  ;;  %v2025_v27 = vpop.f32.mrf.mxu2  ;;  %v2031_v43 = vpop.f32.mrf.mxu1 }
  0xfa   :  { %659 = vmatpush.msrb.mxu1 %v1558_v33  ;;  %2540 = vst [vmem:[#allocation28_spill] sm:$0xff] %v2025_v27 }
  0xfb   :  { %731 = vmatpush.msrb.mxu2 %v1484_v19  ;;  %751 = vmatpush.msra.mxu3 %v1729_v60  ;;  %2543 = vst [vmem:[#allocation31_spill] sm:$0xff] %v2031_v43 }
  0xfc   :  { %660 = vmatpush.msrb.mxu1 %v1575_v36 }
  0xfd   :  { %732 = vmatpush.msrb.mxu2 %v1503_v22  ;;  %752 = vmatpush.msra.mxu3 %v1741_v61 }
  0xfe   :  { %661 = vmatpush.msrb.mxu1 %v1592_v39 }
  0xff   :  { %733 = vmatpush.msrb.mxu2 %v1518_v25  ;;  %753 = vmatpush.msra.mxu3 %v1749_v62 }
 0x100   :  { %662 = vmatpush.msrb.mxu1 %v1607_v42 }
 0x101   :  { %734 = vmatpush.msrb.mxu2 %v1533_v28  ;;  %754 = vmatpush.msra.mxu3 %v1758_v63  ;;  %v2029_v17 = vpop.f32.mrf.mxu2 }
 0x102   :  { %663 = vmatpush.msrb.mxu1 %v1626_v45  ;;  %2542 = vst [vmem:[#allocation30_spill] sm:$0xff] %v2029_v17 }
 0x103   :  { %735 = vmatpush.msrb.mxu2 %v1553_v32  ;;  %755 = vmatpush.msra.mxu3 %v1773_v3 }
 0x104   :  { %664 = vmatpush.msrb.mxu1 %v1645_v49 }
 0x105   :  { %736 = vmatpush.msrb.mxu2 %v1570_v35  ;;  %756 = vmatpush.msra.mxu3 %v2527_v38 }
 0x106   :  { %665 = vmatpush.msrb.mxu1 %v2528_v51 }
 0x107   :  { %737 = vmatpush.msrb.mxu2 %v2529_v53  ;;  %757 = vmatpush.msra.mxu3 %v2530_v5 }
 0x108   :  { %666 = vmatpush.msrb.mxu1 %v2531_v7 }
 0x109   :  { %738 = vmatpush.msrb.mxu2 %v2532_v40  ;;  %758 = vmatpush.msra.mxu3 %v2533_v41  ;;  %v2033_v54 = vpop.f32.mrf.mxu2  ;;  %v2546_v40 = vld [vmem:[#allocation20_spill] sm:$0xff] }
 0x10a   :  { %2544 = vst [vmem:[#allocation32_spill] sm:$0xff] %v2033_v54  ;;  %v135_v24 = vadd.f32 %v134_v8, %v2546_v40 }
 0x166   :  { %v404_v1 = vpop.f32.mrf.mxu1 }
 0x167   :  { %v447_v41 = vadd.f32 %v404_v1, %v2545_v30 }
 0x169   :  { %v1198_v37 = vmul.f32 -1.442695, %v447_v41 }
 0x16b   :  { %1232 = vpow2.f32 %v1198_v37 }
 0x16c   :  { %v424_v18 = vpop.f32.mrf.mxu2 }
 0x16d   :  { %v448_v7 = vadd.f32 %v424_v18, %v135_v24  ;;  %v444_v8 = vpop.f32.mrf.mxu3 }
 0x16e   :  { %v487_v18 = vadd.f32 %v1950_v31, %v444_v8 }
 0x16f   :  { %v1199_v34 = vmul.f32 -1.442695, %v448_v7 }
 0x171   :  { %v1233_v5 = vpop.eup %1232  ;;  %1234 = vpow2.f32 %v1199_v34  ;;  %v176_v34 = vadd.f32 %v175_v46, %v1953_v59 }
 0x172   :  { %v455_v27 = vadd.f32 1.0, %v1233_v5 }
 0x174   :  { %1236 = vrcp.f32 %v455_v27  ;;  %v468_v51 = vand.u32 2147483648, %v455_v27  ;;  %v466_v41 = vand.u32 2147483647, %v455_v27  ;;  %vm462_vm10 = vweird.f32 %v455_v27 }
 0x176   :  { %v469_v7 = vor.u32 1.1754944e-38, %v468_v51  ;;  %vm467_vm12 = vcmp.eq.f32.partialorder %v466_v41, 8.507059e+37 }
 0x177   :  { %v1235_v21 = vpop.eup %1234 }
 0x178   :  { %v456_v17 = vadd.f32 1.0, %v1235_v21 }
 0x17a   :  { %v1237_v53 = vpop.eup %1236  ;;  %1238 = vrcp.f32 %v456_v17  ;;  %v481_v35 = vand.u32 2147483647, %v456_v17  ;;  %vm477_vm14 = vweird.f32 %v456_v17 }
 0x17b   :  { %v458_v43 = vmul.f32 %v1237_v53, %v455_v27  ;;  %vm463_vm9 = vweird.f32 %v1237_v53 }
 0x17c   :  { %vm464_vm11 = vmor %vm462_vm10, %vm463_vm9  ;;  %vm482_vm0 = vcmp.eq.f32.partialorder %v481_v35, 8.507059e+37 }
 0x17d   :  { %v459_v54 = vsub.f32 1.0, %v458_v43 }
 0x17f   :  { %v460_v38 = vmul.f32 %v1237_v53, %v459_v54  ;;  %v483_v54 = vand.u32 2147483648, %v456_v17 }
 0x180   :  { %v1239_v1 = vpop.eup %1238 }
 0x181   :  { %v473_v30 = vmul.f32 %v1239_v1, %v456_v17  ;;  %v461_v37 = vadd.f32 %v1237_v53, %v460_v38  ;;  %vm478_vm13 = vweird.f32 %v1239_v1  ;;  %v484_v38 = vor.u32 1.1754944e-38, %v483_v54  ;;  %v2560_v54 = vld [vmem:[#allocation22_spill] sm:$0xff] }
 0x182   :  { %vm479_vm15 = vmor %vm477_vm14, %vm478_vm13 }
 0x183   :  { %v474_v24 = vsub.f32 1.0, %v473_v30  ;;  %v465_v5 = vsel %vm464_vm11, %v1237_v53, %v461_v37 }
 0x184   :  { %v470_v21 = vsel %vm467_vm12, %v469_v7, %v465_v5 }
 0x185   :  { %v475_v43 = vmul.f32 %v1239_v1, %v474_v24  ;;  %v488_v40 = vmul.f32 %v487_v18, %v470_v21 }
 0x187   :  { %v476_v49 = vadd.f32 %v1239_v1, %v475_v43  ;;  %v489_v3 = vadd.f32 %v488_v40, %v176_v34 }
 0x189   :  { %v480_v27 = vsel %vm479_vm15, %v1239_v1, %v476_v49  ;;  %1240 = vtanh.f32 %v489_v3 }
 0x18a   :  { %v485_v51 = vsel %vm482_vm0, %v484_v38, %v480_v27  ;;  %v179_v38 = vadd.f32 %v2560_v54, %v1953_v59 }
 0x18b   :  { %v491_v53 = vsub.f32 1.0, %v485_v51  ;;  %v493_v46 = vmul.f32 %v485_v51, %v1956_v47 }
 0x18f   :  { %v1241_v41 = vpop.eup %1240 }
 0x190   :  { %v492_v8 = vmul.f32 %v1241_v41, %v491_v53 }
 0x192   :  { %v2040_v30 = vadd.f32 %v493_v46, %v492_v8 }
 0x194   :  { %495 = vst [vmem:[%s2487_s5 + $0x8] sm:$0xff] %v2040_v30  ;;  %515 = vmatmul.f32.vlgmr.msra.gmra.mxu0 %v2040_v30  ;;  %535 = vmatmul.f32.vlgmr.msra.gmra.mxu1 %v2040_v30 }
 0x195   :  { %555 = vmatmul.f32.vlgmr.msra.gmra.mxu2 %v2040_v30  ;;  %763 = vmatpush.msra.mxu0 %v1438_v11  ;;  %v2553_v11 = vld [vmem:[#allocation11_spill] sm:$0xff] }
 0x196   :  { %835 = vmatpush.msra.mxu1 %v1385_v0  ;;  %855 = vmatpush.msra.mxu2 %v1621_v44  ;;  %v2547_v0 = vld [vmem:[#allocation9_spill] sm:$0xff] }
 0x197   :  { %764 = vmatpush.msra.mxu0 %v1445_v12  ;;  %v2554_v12 = vld [vmem:[#allocation8_spill] sm:$0xff] }
 0x198   :  { %836 = vmatpush.msra.mxu1 %v1393_v2  ;;  %856 = vmatpush.msra.mxu2 %v1640_v48  ;;  %v2548_v2 = vld [vmem:[#allocation6_spill] sm:$0xff] }
 0x199   :  { %765 = vmatpush.msra.mxu0 %v1455_v14  ;;  %v2556_v14 = vld [vmem:[#allocation12_spill] sm:$0xff] }
 0x19a   :  { %837 = vmatpush.msra.mxu1 %v1402_v4  ;;  %857 = vmatpush.msra.mxu2 %v1652_v50  ;;  %v2549_v4 = vld [vmem:[#allocation3_spill] sm:$0xff] }
 0x19b   :  { %766 = vmatpush.msra.mxu0 %v1467_v16  ;;  %v2558_v16 = vld [vmem:[#allocation23_spill] sm:$0xff] }
 0x19c   :  { %838 = vmatpush.msra.mxu1 %v1411_v6  ;;  %858 = vmatpush.msra.mxu2 %v1665_v52  ;;  %v2550_v6 = vld [vmem:[#allocation10_spill] sm:$0xff] }
 0x19d   :  { %767 = vmatpush.msra.mxu0 %v1489_v20 }
 0x19e   :  { %839 = vmatpush.msra.mxu1 %v1425_v9  ;;  %859 = vmatpush.msra.mxu2 %v1685_v55  ;;  %v2551_v9 = vld [vmem:[#allocation7_spill] sm:$0xff] }
 0x19f   :  { %768 = vmatpush.msra.mxu0 %v1508_v23  ;;  %v2559_v23 = vld [vmem:[#allocation15_spill] sm:$0xff] }
 0x1a0   :  { %840 = vmatpush.msra.mxu1 %v1433_v10  ;;  %860 = vmatpush.msra.mxu2 %v1697_v56  ;;  %v2552_v10 = vld [vmem:[#allocation4_spill] sm:$0xff] }
 0x1a1   :  { %769 = vmatpush.msra.mxu0 %v1523_v26 }
 0x1a2   :  { %841 = vmatpush.msra.mxu1 %v1450_v13  ;;  %861 = vmatpush.msra.mxu2 %v1705_v57  ;;  %v2555_v13 = vld [vmem:[#allocation5_spill] sm:$0xff] }
 0x1a3   :  { %770 = vmatpush.msra.mxu0 %v1538_v29 }
 0x1a4   :  { %842 = vmatpush.msra.mxu1 %v1462_v15  ;;  %862 = vmatpush.msra.mxu2 %v1714_v58  ;;  %v2557_v15 = vld [vmem:[#allocation20_spill] sm:$0xff] }
 0x1a5   :  { %771 = vmatpush.msra.mxu0 %v1558_v33 }
 0x1a6   :  { %843 = vmatpush.msra.mxu1 %v1484_v19  ;;  %863 = vmatpush.msra.mxu2 %v1729_v60  ;;  %v138_v19 = vadd.f32 %v2558_v16, %v2557_v15  ;;  %v2116_v16 = vld [vmem:[%s2482_s3 + $0x178] sm:$0xff] }
 0x1a7   :  { %772 = vmatpush.msra.mxu0 %v1575_v36 }
 0x1a8   :  { %844 = vmatpush.msra.mxu1 %v1503_v22  ;;  %864 = vmatpush.msra.mxu2 %v1741_v61 }
 0x1a9   :  { %773 = vmatpush.msra.mxu0 %v1592_v39 }
 0x1aa   :  { %845 = vmatpush.msra.mxu1 %v1518_v25  ;;  %865 = vmatpush.msra.mxu2 %v1749_v62 }
 0x1ab   :  { %774 = vmatpush.msra.mxu0 %v1607_v42 }
 0x1ac   :  { %846 = vmatpush.msra.mxu1 %v1533_v28  ;;  %866 = vmatpush.msra.mxu2 %v1758_v63 }
 0x1ad   :  { %775 = vmatpush.msra.mxu0 %v1626_v45 }
 0x1ae   :  { %847 = vmatpush.msra.mxu1 %v1553_v32  ;;  %867 = vmatpush.msra.mxu2 %v2547_v0 }
 0x1af   :  { %776 = vmatpush.msra.mxu0 %v2548_v2 }
 0x1b0   :  { %848 = vmatpush.msra.mxu1 %v2549_v4  ;;  %868 = vmatpush.msra.mxu2 %v2550_v6 }
 0x1b1   :  { %777 = vmatpush.msra.mxu0 %v2551_v9 }
 0x1b2   :  { %849 = vmatpush.msra.mxu1 %v2552_v10  ;;  %869 = vmatpush.msra.mxu2 %v2553_v11 }
 0x1b3   :  { %778 = vmatpush.msra.mxu0 %v2554_v12 }
 0x1b4   :  { %850 = vmatpush.msra.mxu1 %v2555_v13  ;;  %870 = vmatpush.msra.mxu2 %v2556_v14 }
 0x211   :  { %v516_v20 = vpop.f32.mrf.mxu0  ;;  %v536_v22 = vpop.f32.mrf.mxu1 }
 0x212   :  { %v559_v25 = vadd.f32 %v516_v20, %v2559_v23  ;;  %v560_v26 = vadd.f32 %v536_v22, %v138_v19  ;;  %v2129_v19 = vld [vmem:[%s2482_s3 + $0x160] sm:$0xff]  ;;  %v2135_v20 = vld [vmem:[%s2482_s3 + $0x150] sm:$0xff]  ;;  %v2148_v22 = vld [vmem:[%s2482_s3 + $0x138] sm:$0xff] }
 0x213   :  { %v2161_v23 = vld [vmem:[%s2482_s3 + $0x120] sm:$0xff] }
 0x214   :  { %v1200_v28 = vmul.f32 -1.442695, %v559_v25  ;;  %v1201_v29 = vmul.f32 -1.442695, %v560_v26  ;;  %v2174_v25 = vld [vmem:[%s2482_s3 + $0x108] sm:$0xff]  ;;  %v2187_v26 = vld [vmem:[%s2482_s3 + $0xf0] sm:$0xff] }
 0x216   :  { %1242 = vpow2.f32 %v1200_v28  ;;  %v2200_v28 = vld [vmem:[%s2482_s3 + $0xd8] sm:$0xff] }
 0x217   :  { %1244 = vpow2.f32 %v1201_v29  ;;  %v2213_v29 = vld [vmem:[%s2482_s3 + $0xc0] sm:$0xff] }
 0x218   :  { %v556_v7 = vpop.f32.mrf.mxu2 }
 0x219   :  { %v599_v34 = vadd.f32 %v1950_v31, %v556_v7 }
 0x21c   :  { %v1243_v32 = vpop.eup %1242 }
 0x21d   :  { %v1245_v33 = vpop.eup %1244  ;;  %v567_v35 = vadd.f32 1.0, %v1243_v32  ;;  %v2226_v32 = vld [vmem:[%s2482_s3 + $0xa8] sm:$0xff] }
 0x21e   :  { %v568_v36 = vadd.f32 1.0, %v1245_v33  ;;  %v2239_v33 = vld [vmem:[%s2482_s3 + $0x90] sm:$0xff] }
 0x21f   :  { %1246 = vrcp.f32 %v567_v35  ;;  %v580_v40 = vand.u32 2147483648, %v567_v35  ;;  %v578_v1 = vand.u32 2147483647, %v567_v35  ;;  %vm574_vm2 = vweird.f32 %v567_v35 }
 0x220   :  { %1248 = vrcp.f32 %v568_v36  ;;  %v595_v27 = vand.u32 2147483648, %v568_v36  ;;  %vm589_vm6 = vweird.f32 %v568_v36  ;;  %v593_v53 = vand.u32 2147483647, %v568_v36 }
 0x221   :  { %v581_v5 = vor.u32 1.1754944e-38, %v580_v40  ;;  %vm579_vm4 = vcmp.eq.f32.partialorder %v578_v1, 8.507059e+37 }
 0x222   :  { %v596_v46 = vor.u32 1.1754944e-38, %v595_v27  ;;  %vm594_vm8 = vcmp.eq.f32.partialorder %v593_v53, 8.507059e+37 }
 0x225   :  { %v1247_v39 = vpop.eup %1246 }
 0x226   :  { %v1249_v42 = vpop.eup %1248  ;;  %v570_v45 = vmul.f32 %v1247_v39, %v567_v35  ;;  %vm575_vm1 = vweird.f32 %v1247_v39  ;;  %v2252_v35 = vld [vmem:[%s2482_s3 + $0x78] sm:$0xff] }
 0x227   :  { %v585_v49 = vmul.f32 %v1249_v42, %v568_v36  ;;  %vm576_vm3 = vmor %vm574_vm2, %vm575_vm1  ;;  %vm590_vm5 = vweird.f32 %v1249_v42  ;;  %v2265_v36 = vld [vmem:[%s2482_s3 + $0x60] sm:$0xff] }
 0x228   :  { %v571_v3 = vsub.f32 1.0, %v570_v45  ;;  %vm591_vm7 = vmor %vm589_vm6, %vm590_vm5  ;;  %v2304_v45 = vld [vmem:[%s2482_s3 + $0x18] sm:$0xff] }
 0x229   :  { %v586_v47 = vsub.f32 1.0, %v585_v49  ;;  %v2317_v49 = vld [vmem:[%s2482_s3] sm:$0xff] }
 0x22a   :  { %v572_v17 = vmul.f32 %v1247_v39, %v571_v3  ;;  %v2561_v3 = vld [vmem:[#allocation25_spill] sm:$0xff] }
 0x22b   :  { %v587_v37 = vmul.f32 %v1249_v42, %v586_v47  ;;  %v141_v47 = vadd.f32 %v2561_v3, %v2557_v15 }
 0x22c   :  { %v573_v24 = vadd.f32 %v1247_v39, %v572_v17 }
 0x22d   :  { %v588_v21 = vadd.f32 %v1249_v42, %v587_v37  ;;  %v2562_v37 = vld [vmem:[#allocation16_spill] sm:$0xff] }
 0x22e   :  { %v577_v18 = vsel %vm576_vm3, %v1247_v39, %v573_v24  ;;  %v2278_v39 = vld [vmem:[%s2482_s3 + $0x48] sm:$0xff] }
 0x22f   :  { %v582_v43 = vsel %vm579_vm4, %v581_v5, %v577_v18  ;;  %v592_v8 = vsel %vm591_vm7, %v1249_v42, %v588_v21  ;;  %v2291_v42 = vld [vmem:[%s2482_s3 + $0x30] sm:$0xff] }
 0x230   :  { %v600_v51 = vmul.f32 %v599_v34, %v582_v43  ;;  %v597_v2 = vsel %vm594_vm8, %v596_v46, %v592_v8 }
 0x231   :  { %v603_v4 = vsub.f32 1.0, %v597_v2  ;;  %v605_v12 = vmul.f32 %v597_v2, %v2040_v30  ;;  %v2122_v30 = vld [vmem:[%s2482_s3 + $0x168] sm:$0xff] }
 0x232   :  { %v601_v41 = vadd.f32 %v600_v51, %v179_v38 }
 0x234   :  { %1250 = vtanh.f32 %v601_v41 }
 0x23a   :  { %v1251_v9 = vpop.eup %1250 }
 0x23b   :  { %v604_v10 = vmul.f32 %v1251_v9, %v603_v4 }
 0x23d   :  { %v2104_v13 = vadd.f32 %v605_v12, %v604_v10 }
 0x23f   :  { %607 = vst [vmem:[%s2487_s5 + $0x10] sm:$0xff] %v2104_v13  ;;  %627 = vmatmul.f32.vlgmr.msrb.gmra.mxu3 %v2104_v13  ;;  %647 = vmatmul.f32.vlgmr.msrb.gmra.mxu0 %v2104_v13 }
 0x240   :  { %667 = vmatmul.f32.vlgmr.msrb.gmra.mxu1 %v2104_v13  ;;  %875 = vmatpush.msrb.mxu3 %v2116_v16 }
 0x241   :  { %947 = vmatpush.msrb.mxu0 %v2122_v30  ;;  %967 = vmatpush.msrb.mxu1 %v1621_v44  ;;  %v2142_v44 = vld [vmem:[%s2482_s3 + $0x148] sm:$0xff] }
 0x242   :  { %876 = vmatpush.msrb.mxu3 %v2129_v19 }
 0x243   :  { %948 = vmatpush.msrb.mxu0 %v2135_v20  ;;  %968 = vmatpush.msrb.mxu1 %v1640_v48  ;;  %v2155_v48 = vld [vmem:[%s2482_s3 + $0x130] sm:$0xff] }
 0x244   :  { %877 = vmatpush.msrb.mxu3 %v2142_v44 }
 0x245   :  { %949 = vmatpush.msrb.mxu0 %v2148_v22  ;;  %969 = vmatpush.msrb.mxu1 %v1652_v50  ;;  %v2168_v50 = vld [vmem:[%s2482_s3 + $0x118] sm:$0xff] }
 0x246   :  { %878 = vmatpush.msrb.mxu3 %v2155_v48 }
 0x247   :  { %950 = vmatpush.msrb.mxu0 %v2161_v23  ;;  %970 = vmatpush.msrb.mxu1 %v1665_v52  ;;  %v2181_v52 = vld [vmem:[%s2482_s3 + $0x100] sm:$0xff] }
 0x248   :  { %879 = vmatpush.msrb.mxu3 %v2168_v50 }
 0x249   :  { %951 = vmatpush.msrb.mxu0 %v2174_v25  ;;  %971 = vmatpush.msrb.mxu1 %v1685_v55  ;;  %v2194_v55 = vld [vmem:[%s2482_s3 + $0xe8] sm:$0xff] }
 0x24a   :  { %880 = vmatpush.msrb.mxu3 %v2181_v52 }
 0x24b   :  { %952 = vmatpush.msrb.mxu0 %v2187_v26  ;;  %972 = vmatpush.msrb.mxu1 %v1697_v56  ;;  %v2207_v56 = vld [vmem:[%s2482_s3 + $0xd0] sm:$0xff] }
 0x24c   :  { %881 = vmatpush.msrb.mxu3 %v2194_v55 }
 0x24d   :  { %953 = vmatpush.msrb.mxu0 %v2200_v28  ;;  %973 = vmatpush.msrb.mxu1 %v1705_v57  ;;  %v2220_v57 = vld [vmem:[%s2482_s3 + $0xb8] sm:$0xff] }
 0x24e   :  { %882 = vmatpush.msrb.mxu3 %v2207_v56 }
 0x24f   :  { %954 = vmatpush.msrb.mxu0 %v2213_v29  ;;  %974 = vmatpush.msrb.mxu1 %v1714_v58  ;;  %v2233_v58 = vld [vmem:[%s2482_s3 + $0xa0] sm:$0xff] }
 0x250   :  { %883 = vmatpush.msrb.mxu3 %v2220_v57 }
 0x251   :  { %955 = vmatpush.msrb.mxu0 %v2226_v32  ;;  %975 = vmatpush.msrb.mxu1 %v1729_v60  ;;  %v2246_v60 = vld [vmem:[%s2482_s3 + $0x88] sm:$0xff] }
 0x252   :  { %884 = vmatpush.msrb.mxu3 %v2233_v58 }
 0x253   :  { %956 = vmatpush.msrb.mxu0 %v2239_v33  ;;  %976 = vmatpush.msrb.mxu1 %v1741_v61  ;;  %v2259_v61 = vld [vmem:[%s2482_s3 + $0x70] sm:$0xff] }
 0x254   :  { %885 = vmatpush.msrb.mxu3 %v2246_v60 }
 0x255   :  { %957 = vmatpush.msrb.mxu0 %v2252_v35  ;;  %977 = vmatpush.msrb.mxu1 %v1749_v62  ;;  %v2272_v62 = vld [vmem:[%s2482_s3 + $0x58] sm:$0xff] }
 0x256   :  { %886 = vmatpush.msrb.mxu3 %v2259_v61 }
 0x257   :  { %958 = vmatpush.msrb.mxu0 %v2265_v36  ;;  %978 = vmatpush.msrb.mxu1 %v1758_v63  ;;  %v2285_v63 = vld [vmem:[%s2482_s3 + $0x40] sm:$0xff] }
 0x258   :  { %887 = vmatpush.msrb.mxu3 %v2272_v62 }
 0x259   :  { %959 = vmatpush.msrb.mxu0 %v2278_v39  ;;  %979 = vmatpush.msrb.mxu1 %v2547_v0  ;;  %v2298_v0 = vld [vmem:[%s2482_s3 + $0x28] sm:$0xff] }
 0x25a   :  { %888 = vmatpush.msrb.mxu3 %v2285_v63 }
 0x25b   :  { %960 = vmatpush.msrb.mxu0 %v2291_v42  ;;  %980 = vmatpush.msrb.mxu1 %v2550_v6  ;;  %v2311_v6 = vld [vmem:[%s2482_s3 + $0x10] sm:$0xff] }
 0x25c   :  { %889 = vmatpush.msrb.mxu3 %v2298_v0 }
 0x25d   :  { %961 = vmatpush.msrb.mxu0 %v2304_v45  ;;  %981 = vmatpush.msrb.mxu1 %v2553_v11 }
 0x25e   :  { %890 = vmatpush.msrb.mxu3 %v2311_v6 }
 0x25f   :  { %962 = vmatpush.msrb.mxu0 %v2317_v49  ;;  %982 = vmatpush.msrb.mxu1 %v2556_v14 }
 0x2bc   :  { %v648_v11 = vpop.f32.mrf.mxu0 }
 0x2bd   :  { %v672_v40 = vadd.f32 %v648_v11, %v141_v47  ;;  %v668_v2 = vpop.f32.mrf.mxu1  ;;  %v2563_v11 = vld [vmem:[#allocation24_spill] sm:$0xff] }
 0x2be   :  { %v711_v10 = vadd.f32 %v1950_v31, %v668_v2 }
 0x2bf   :  { %v1203_v17 = vmul.f32 -1.442695, %v672_v40  ;;  %v182_v40 = vadd.f32 %v2563_v11, %v1953_v59 }
 0x2c1   :  { %1252 = vpow2.f32 %v1203_v17 }
 0x2c2   :  { %v628_v1 = vpop.f32.mrf.mxu3 }
 0x2c3   :  { %v671_v7 = vadd.f32 %v628_v1, %v2562_v37 }
 0x2c5   :  { %v1202_v24 = vmul.f32 -1.442695, %v671_v7 }
 0x2c7   :  { %v1253_v5 = vpop.eup %1252  ;;  %1254 = vpow2.f32 %v1202_v24 }
 0x2c8   :  { %v680_v18 = vadd.f32 1.0, %v1253_v5 }
 0x2ca   :  { %1256 = vrcp.f32 %v680_v18  ;;  %v707_v17 = vand.u32 2147483648, %v680_v18  ;;  %vm701_vm14 = vweird.f32 %v680_v18  ;;  %v705_v37 = vand.u32 2147483647, %v680_v18 }
 0x2cc   :  { %v708_v5 = vor.u32 1.1754944e-38, %v707_v17  ;;  %vm706_vm0 = vcmp.eq.f32.partialorder %v705_v37, 8.507059e+37 }
 0x2cd   :  { %v1255_v34 = vpop.eup %1254 }
 0x2ce   :  { %v679_v21 = vadd.f32 1.0, %v1255_v34 }
 0x2d0   :  { %1258 = vrcp.f32 %v679_v21  ;;  %v1257_v43 = vpop.eup %1256  ;;  %v692_v53 = vand.u32 2147483648, %v679_v21  ;;  %v690_v8 = vand.u32 2147483647, %v679_v21  ;;  %vm686_vm10 = vweird.f32 %v679_v21 }
 0x2d1   :  { %v697_v14 = vmul.f32 %v1257_v43, %v680_v18  ;;  %vm702_vm13 = vweird.f32 %v1257_v43  ;;  %v1335_v18 = vld [vmem:[%s2482_s3 + $0x158] sm:$0xff] }
 0x2d2   :  { %v693_v9 = vor.u32 1.1754944e-38, %v692_v53  ;;  %vm691_vm12 = vcmp.eq.f32.partialorder %v690_v8, 8.507059e+37  ;;  %vm703_vm15 = vmor %vm701_vm14, %vm702_vm13 }
 0x2d3   :  { %v698_v27 = vsub.f32 1.0, %v697_v14 }
 0x2d5   :  { %v699_v46 = vmul.f32 %v1257_v43, %v698_v27 }
 0x2d6   :  { %v1259_v54 = vpop.eup %1258 }
 0x2d7   :  { %v682_v38 = vmul.f32 %v1259_v54, %v679_v21  ;;  %vm687_vm9 = vweird.f32 %v1259_v54  ;;  %v700_v3 = vadd.f32 %v1257_v43, %v699_v46 }
 0x2d8   :  { %vm688_vm11 = vmor %vm686_vm10, %vm687_vm9 }
 0x2d9   :  { %v683_v51 = vsub.f32 1.0, %v682_v38  ;;  %v704_v24 = vsel %vm703_vm15, %v1257_v43, %v700_v3  ;;  %v2564_v43 = vld [vmem:[#allocation27_spill] sm:$0xff] }
 0x2da   :  { %v709_v34 = vsel %vm706_vm0, %v708_v5, %v704_v24 }
 0x2db   :  { %v684_v41 = vmul.f32 %v1259_v54, %v683_v51  ;;  %v715_v21 = vsub.f32 1.0, %v709_v34  ;;  %v717_v38 = vmul.f32 %v709_v34, %v2104_v13  ;;  %v1334_v13 = vld [vmem:[%s2482_s3 + $0x170] sm:$0xff]  ;;  %v144_v51 = vadd.f32 %v2564_v43, %v2557_v15 }
 0x2dd   :  { %v685_v4 = vadd.f32 %v1259_v54, %v684_v41 }
 0x2df   :  { %v689_v12 = vsel %vm688_vm11, %v1259_v54, %v685_v4 }
 0x2e0   :  { %v694_v47 = vsel %vm691_vm12, %v693_v9, %v689_v12 }
 0x2e1   :  { %v712_v1 = vmul.f32 %v711_v10, %v694_v47 }
 0x2e3   :  { %v713_v7 = vadd.f32 %v712_v1, %v182_v40 }
 0x2e5   :  { %1260 = vtanh.f32 %v713_v7 }
 0x2eb   :  { %v1261_v14 = vpop.eup %1260 }
 0x2ec   :  { %v716_v54 = vmul.f32 %v1261_v14, %v715_v21 }
 0x2ee   :  { %v2328_v27 = vadd.f32 %v717_v38, %v716_v54 }
 0x2f0   :  { %719 = vst [vmem:[%s2487_s5 + $0x18] sm:$0xff] %v2328_v27  ;;  %739 = vmatmul.f32.vlgmr.msrb.gmra.mxu2 %v2328_v27  ;;  %759 = vmatmul.f32.vlgmr.msra.gmra.mxu3 %v2328_v27 }
 0x2f1   :  { %779 = vmatmul.f32.vlgmr.msra.gmra.mxu0 %v2328_v27  ;;  %987 = vmatpush.msrb.mxu2 %v2116_v16 }
 0x2f2   :  { %1059 = vmatpush.msra.mxu3 %v2122_v30  ;;  %1079 = vmatpush.msra.mxu0 %v1334_v13  ;;  %v1336_v30 = vld [vmem:[%s2482_s3 + $0x140] sm:$0xff] }
 0x2f3   :  { %988 = vmatpush.msrb.mxu2 %v2129_v19 }
 0x2f4   :  { %1060 = vmatpush.msra.mxu3 %v2135_v20  ;;  %1080 = vmatpush.msra.mxu0 %v1335_v18  ;;  %v1337_v20 = vld [vmem:[%s2482_s3 + $0x128] sm:$0xff] }
 0x2f5   :  { %989 = vmatpush.msrb.mxu2 %v2142_v44 }
 0x2f6   :  { %1061 = vmatpush.msra.mxu3 %v2148_v22  ;;  %1081 = vmatpush.msra.mxu0 %v1336_v30  ;;  %v1338_v22 = vld [vmem:[%s2482_s3 + $0x110] sm:$0xff]  ;;  %v2566_v30 = vld [vmem:[#allocation26_spill] sm:$0xff] }
 0x2f7   :  { %990 = vmatpush.msrb.mxu2 %v2155_v48 }
 0x2f8   :  { %1062 = vmatpush.msra.mxu3 %v2161_v23  ;;  %1082 = vmatpush.msra.mxu0 %v1337_v20  ;;  %v1339_v23 = vld [vmem:[%s2482_s3 + $0xf8] sm:$0xff]  ;;  %v185_v20 = vadd.f32 %v2566_v30, %v1953_v59 }
 0x2f9   :  { %991 = vmatpush.msrb.mxu2 %v2168_v50 }
 0x2fa   :  { %1063 = vmatpush.msra.mxu3 %v2174_v25  ;;  %1083 = vmatpush.msra.mxu0 %v1338_v22  ;;  %v1340_v25 = vld [vmem:[%s2482_s3 + $0xe0] sm:$0xff] }
 0x2fb   :  { %992 = vmatpush.msrb.mxu2 %v2181_v52 }
 0x2fc   :  { %1064 = vmatpush.msra.mxu3 %v2187_v26  ;;  %1084 = vmatpush.msra.mxu0 %v1339_v23  ;;  %v1341_v26 = vld [vmem:[%s2482_s3 + $0xc8] sm:$0xff] }
 0x2fd   :  { %993 = vmatpush.msrb.mxu2 %v2194_v55 }
 0x2fe   :  { %1065 = vmatpush.msra.mxu3 %v2200_v28  ;;  %1085 = vmatpush.msra.mxu0 %v1340_v25  ;;  %v1342_v28 = vld [vmem:[%s2482_s3 + $0xb0] sm:$0xff] }
 0x2ff   :  { %994 = vmatpush.msrb.mxu2 %v2207_v56 }
 0x300   :  { %1066 = vmatpush.msra.mxu3 %v2213_v29  ;;  %1086 = vmatpush.msra.mxu0 %v1341_v26  ;;  %v1343_v29 = vld [vmem:[%s2482_s3 + $0x98] sm:$0xff] }
 0x301   :  { %995 = vmatpush.msrb.mxu2 %v2220_v57 }
 0x302   :  { %1067 = vmatpush.msra.mxu3 %v2226_v32  ;;  %1087 = vmatpush.msra.mxu0 %v1342_v28  ;;  %v1344_v32 = vld [vmem:[%s2482_s3 + $0x80] sm:$0xff] }
 0x303   :  { %996 = vmatpush.msrb.mxu2 %v2233_v58 }
 0x304   :  { %1068 = vmatpush.msra.mxu3 %v2239_v33  ;;  %1088 = vmatpush.msra.mxu0 %v1343_v29  ;;  %v1345_v33 = vld [vmem:[%s2482_s3 + $0x68] sm:$0xff] }
 0x305   :  { %997 = vmatpush.msrb.mxu2 %v2246_v60 }
 0x306   :  { %1069 = vmatpush.msra.mxu3 %v2252_v35  ;;  %1089 = vmatpush.msra.mxu0 %v1344_v32  ;;  %v1346_v35 = vld [vmem:[%s2482_s3 + $0x50] sm:$0xff] }
 0x307   :  { %998 = vmatpush.msrb.mxu2 %v2259_v61 }
 0x308   :  { %1070 = vmatpush.msra.mxu3 %v2265_v36  ;;  %1090 = vmatpush.msra.mxu0 %v1345_v33  ;;  %v1347_v36 = vld [vmem:[%s2482_s3 + $0x38] sm:$0xff] }
 0x309   :  { %999 = vmatpush.msrb.mxu2 %v2272_v62 }
 0x30a   :  { %1071 = vmatpush.msra.mxu3 %v2278_v39  ;;  %1091 = vmatpush.msra.mxu0 %v1346_v35  ;;  %v1348_v39 = vld [vmem:[%s2482_s3 + $0x20] sm:$0xff] }
 0x30b   :  { %1000 = vmatpush.msrb.mxu2 %v2285_v63 }
 0x30c   :  { %1072 = vmatpush.msra.mxu3 %v2291_v42  ;;  %1092 = vmatpush.msra.mxu0 %v1347_v36  ;;  %v1349_v42 = vld [vmem:[%s2482_s3 + $0x8] sm:$0xff] }
 0x30d   :  { %1001 = vmatpush.msrb.mxu2 %v2298_v0 }
 0x30e   :  { %1073 = vmatpush.msra.mxu3 %v2304_v45  ;;  %1093 = vmatpush.msra.mxu0 %v1348_v39  ;;  %v2565_v45 = vld [vmem:[#allocation17_spill] sm:$0xff] }
 0x30f   :  { %1002 = vmatpush.msrb.mxu2 %v2311_v6 }
 0x310   :  { %1074 = vmatpush.msra.mxu3 %v2317_v49  ;;  %1094 = vmatpush.msra.mxu0 %v1349_v42 }
 0x36e   :  { %v780_v5 = vpop.f32.mrf.mxu0 }
 0x36f   :  { %v823_v54 = vadd.f32 %v1950_v31, %v780_v5 }
 0x373   :  { %v740_v53 = vpop.f32.mrf.mxu2  ;;  %v760_v41 = vpop.f32.mrf.mxu3 }
 0x374   :  { %v783_v8 = vadd.f32 %v740_v53, %v2565_v45  ;;  %v784_v46 = vadd.f32 %v760_v41, %v144_v51 }
 0x376   :  { %v1204_v2 = vmul.f32 -1.442695, %v783_v8  ;;  %v1205_v4 = vmul.f32 -1.442695, %v784_v46 }
 0x378   :  { %1262 = vpow2.f32 %v1204_v2 }
 0x379   :  { %1264 = vpow2.f32 %v1205_v4  ;;  %v2455_v4 = vld [vmem:[%s2485_s4] ss:$0 sm:$0xff] }
 0x37e   :  { %v1263_v9 = vpop.eup %1262 }
 0x37f   :  { %v1265_v10 = vpop.eup %1264  ;;  %v791_v49 = vadd.f32 1.0, %v1263_v9 }
 0x380   :  { %v792_v12 = vadd.f32 1.0, %v1265_v10  ;;  %v2569_v10 = vld [vmem:[#allocation28_spill] sm:$0xff] }
 0x381   :  { %1266 = vrcp.f32 %v791_v49  ;;  %v804_v1 = vand.u32 2147483648, %v791_v49  ;;  %v802_v24 = vand.u32 2147483647, %v791_v49  ;;  %vm798_vm2 = vweird.f32 %v791_v49 }
 0x382   :  { %1268 = vrcp.f32 %v792_v12  ;;  %v819_v23 = vand.u32 2147483648, %v792_v12  ;;  %vm813_vm6 = vweird.f32 %v792_v12  ;;  %v817_v25 = vand.u32 2147483647, %v792_v12 }
 0x383   :  { %v805_v14 = vor.u32 1.1754944e-38, %v804_v1  ;;  %vm803_vm4 = vcmp.eq.f32.partialorder %v802_v24, 8.507059e+37 }
 0x384   :  { %v820_v29 = vor.u32 1.1754944e-38, %v819_v23  ;;  %vm818_vm8 = vcmp.eq.f32.partialorder %v817_v25, 8.507059e+37 }
 0x387   :  { %v1267_v3 = vpop.eup %1266 }
 0x388   :  { %v1269_v47 = vpop.eup %1268  ;;  %v794_v11 = vmul.f32 %v1267_v3, %v791_v49  ;;  %vm799_vm1 = vweird.f32 %v1267_v3  ;;  %v188_v49 = vadd.f32 %v2569_v10, %v1953_v59  ;;  %v2573_v10 = vld [vmem:[#allocation21_spill] sm:$0xff] }
 0x389   :  { %v809_v40 = vmul.f32 %v1269_v47, %v792_v12  ;;  %vm800_vm3 = vmor %vm798_vm2, %vm799_vm1  ;;  %vm814_vm5 = vweird.f32 %v1269_v47 }
 0x38a   :  { %v795_v17 = vsub.f32 1.0, %v794_v11  ;;  %vm815_vm7 = vmor %vm813_vm6, %vm814_vm5 }
 0x38b   :  { %v810_v37 = vsub.f32 1.0, %v809_v40 }
 0x38c   :  { %v796_v7 = vmul.f32 %v1267_v3, %v795_v17 }
 0x38d   :  { %v811_v34 = vmul.f32 %v1269_v47, %v810_v37 }
 0x38e   :  { %v797_v21 = vadd.f32 %v1267_v3, %v796_v7 }
 0x38f   :  { %v812_v18 = vadd.f32 %v1269_v47, %v811_v34 }
 0x390   :  { %v801_v38 = vsel %vm800_vm3, %v1267_v3, %v797_v21 }
 0x391   :  { %v806_v13 = vsel %vm803_vm4, %v805_v14, %v801_v38  ;;  %v816_v28 = vsel %vm815_vm7, %v1269_v47, %v812_v18  ;;  %v2570_v38 = vld [vmem:[#allocation31_spill] sm:$0xff] }
 0x392   :  { %v824_v22 = vmul.f32 %v823_v54, %v806_v13  ;;  %v821_v32 = vsel %vm818_vm8, %v820_v29, %v816_v28  ;;  %v150_v13 = vadd.f32 %v2570_v38, %v2557_v15 }
 0x393   :  { %v827_v31 = vsub.f32 1.0, %v821_v32  ;;  %v829_v36 = vmul.f32 %v821_v32, %v2328_v27 }
 0x394   :  { %v825_v26 = vadd.f32 %v824_v22, %v185_v20  ;;  %v2571_v20 = vld [vmem:[#allocation19_spill] sm:$0xff] }
 0x396   :  { %1270 = vtanh.f32 %v825_v26 }
 0x39c   :  { %v1271_v33 = vpop.eup %1270 }
 0x39d   :  { %v828_v35 = vmul.f32 %v1271_v33, %v827_v31 }
 0x39f   :  { %v2424_v39 = vadd.f32 %v829_v36, %v828_v35 }
 0x3a1   :  { %831 = vst [vmem:[%s2487_s5 + $0x20] sm:$0xff] %v2424_v39  ;;  %851 = vmatmul.f32.vlgmr.msra.gmra.mxu1 %v2424_v39  ;;  %871 = vmatmul.f32.vlgmr.msra.gmra.mxu2 %v2424_v39 }
 0x3a2   :  { %891 = vmatmul.f32.vlgmr.msrb.gmra.mxu3 %v2424_v39  ;;  %1099 = vmatpush.msra.mxu1 %v2116_v16 }
 0x3a4   :  { %1100 = vmatpush.msra.mxu1 %v2129_v19  ;;  %v2567_v19 = vld [vmem:[#allocation18_spill] sm:$0xff] }
 0x3a6   :  { %1101 = vmatpush.msra.mxu1 %v2142_v44 }
 0x3a8   :  { %1102 = vmatpush.msra.mxu1 %v2155_v48 }
 0x3aa   :  { %1103 = vmatpush.msra.mxu1 %v2168_v50  ;;  %v2568_v50 = vld [vmem:[#allocation29_spill] sm:$0xff] }
 0x3ac   :  { %1104 = vmatpush.msra.mxu1 %v2181_v52  ;;  %v147_v52 = vadd.f32 %v2568_v50, %v2557_v15 }
 0x3ae   :  { %1105 = vmatpush.msra.mxu1 %v2194_v55 }
 0x3b0   :  { %1106 = vmatpush.msra.mxu1 %v2207_v56 }
 0x3b2   :  { %1107 = vmatpush.msra.mxu1 %v2220_v57 }
 0x3b4   :  { %1108 = vmatpush.msra.mxu1 %v2233_v58 }
 0x3b6   :  { %1109 = vmatpush.msra.mxu1 %v2246_v60 }
 0x3b8   :  { %1110 = vmatpush.msra.mxu1 %v2259_v61 }
 0x3ba   :  { %1111 = vmatpush.msra.mxu1 %v2272_v62 }
 0x3bc   :  { %1112 = vmatpush.msra.mxu1 %v2285_v63 }
 0x3be   :  { %1113 = vmatpush.msra.mxu1 %v2298_v0 }
 0x3c0   :  { %1114 = vmatpush.msra.mxu1 %v2311_v6 }
 0x41e   :  { %v852_v16 = vpop.f32.mrf.mxu1 }
 0x41f   :  { %v895_v44 = vadd.f32 %v852_v16, %v2567_v19 }
 0x421   :  { %v1206_v48 = vmul.f32 -1.442695, %v895_v44 }
 0x423   :  { %1272 = vpow2.f32 %v1206_v48 }
 0x424   :  { %v872_v55 = vpop.f32.mrf.mxu2 }
 0x425   :  { %v896_v56 = vadd.f32 %v872_v55, %v147_v52  ;;  %v892_v53 = vpop.f32.mrf.mxu3 }
 0x426   :  { %v935_v9 = vadd.f32 %v2455_v4, %v892_v53 }
 0x427   :  { %v1207_v57 = vmul.f32 -1.442695, %v896_v56 }
 0x429   :  { %v1273_v58 = vpop.eup %1272  ;;  %1274 = vpow2.f32 %v1207_v57 }
 0x42a   :  { %v903_v60 = vadd.f32 1.0, %v1273_v58 }
 0x42c   :  { %1276 = vrcp.f32 %v903_v60  ;;  %v916_v27 = vand.u32 2147483648, %v903_v60  ;;  %v914_v43 = vand.u32 2147483647, %v903_v60  ;;  %vm910_vm10 = vweird.f32 %v903_v60 }
 0x42e   :  { %v917_v8 = vor.u32 1.1754944e-38, %v916_v27  ;;  %vm915_vm12 = vcmp.eq.f32.partialorder %v914_v43, 8.507059e+37 }
 0x42f   :  { %v1275_v61 = vpop.eup %1274 }
 0x430   :  { %v904_v62 = vadd.f32 1.0, %v1275_v61 }
 0x432   :  { %v1277_v63 = vpop.eup %1276  ;;  %1278 = vrcp.f32 %v904_v62  ;;  %v931_v47 = vand.u32 2147483648, %v904_v62  ;;  %v929_v40 = vand.u32 2147483647, %v904_v62  ;;  %vm925_vm14 = vweird.f32 %v904_v62 }
 0x433   :  { %v906_v0 = vmul.f32 %v1277_v63, %v903_v60  ;;  %vm911_vm9 = vweird.f32 %v1277_v63 }
 0x434   :  { %vm912_vm11 = vmor %vm910_vm10, %vm911_vm9  ;;  %v932_v37 = vor.u32 1.1754944e-38, %v931_v47  ;;  %vm930_vm0 = vcmp.eq.f32.partialorder %v929_v40, 8.507059e+37  ;;  %v2574_v40 = vld [vmem:[#allocation14_spill] sm:$0xff] }
 0x435   :  { %v907_v6 = vsub.f32 1.0, %v906_v0 }
 0x437   :  { %v908_v42 = vmul.f32 %v1277_v63, %v907_v6 }
 0x438   :  { %v1279_v51 = vpop.eup %1278 }
 0x439   :  { %v921_v41 = vmul.f32 %v1279_v51, %v904_v62  ;;  %v909_v45 = vadd.f32 %v1277_v63, %v908_v42  ;;  %vm926_vm13 = vweird.f32 %v1279_v51 }
 0x43a   :  { %vm927_vm15 = vmor %vm925_vm14, %vm926_vm13 }
 0x43b   :  { %v922_v46 = vsub.f32 1.0, %v921_v41  ;;  %v913_v2 = vsel %vm912_vm11, %v1277_v63, %v909_v45  ;;  %v2572_v63 = vld [vmem:[#allocation30_spill] sm:$0xff] }
 0x43c   :  { %v918_v12 = vsel %vm915_vm12, %v917_v8, %v913_v2  ;;  %v191_v0 = vadd.f32 %v2572_v63, %v1953_v59 }
 0x43d   :  { %v923_v3 = vmul.f32 %v1279_v51, %v922_v46  ;;  %v936_v11 = vmul.f32 %v935_v9, %v918_v12 }
 0x43f   :  { %v924_v17 = vadd.f32 %v1279_v51, %v923_v3  ;;  %v937_v1 = vadd.f32 %v936_v11, %v188_v49  ;;  %v153_v49 = vadd.f32 %v2573_v10, %v2557_v15 }
 0x441   :  { %v928_v7 = vsel %vm927_vm15, %v1279_v51, %v924_v17  ;;  %1280 = vtanh.f32 %v937_v1 }
 0x442   :  { %v933_v24 = vsel %vm930_vm0, %v932_v37, %v928_v7 }
 0x443   :  { %v939_v5 = vsub.f32 1.0, %v933_v24  ;;  %v941_v14 = vmul.f32 %v933_v24, %v2424_v39 }
 0x447   :  { %v1281_v34 = vpop.eup %1280 }
 0x448   :  { %v940_v21 = vmul.f32 %v1281_v34, %v939_v5 }
 0x44a   :  { %v942_v54 = vadd.f32 %v941_v14, %v940_v21 }
 0x44c   :  { %943 = vst [vmem:[%s2487_s5 + $0x28] sm:$0xff] %v942_v54  ;;  %963 = vmatmul.f32.vlgmr.msrb.gmra.mxu0 %v942_v54  ;;  %983 = vmatmul.f32.vlgmr.msrb.gmra.mxu1 %v942_v54 }
 0x44d   :  { %1003 = vmatmul.f32.vlgmr.msrb.gmra.mxu2 %v942_v54 }
 0x4c9   :  { %v964_v18 = vpop.f32.mrf.mxu0  ;;  %v984_v30 = vpop.f32.mrf.mxu1 }
 0x4ca   :  { %v1007_v22 = vadd.f32 %v964_v18, %v2571_v20  ;;  %v1008_v23 = vadd.f32 %v984_v30, %v150_v13 }
 0x4cc   :  { %v1208_v25 = vmul.f32 -1.442695, %v1007_v22  ;;  %v1209_v26 = vmul.f32 -1.442695, %v1008_v23 }
 0x4ce   :  { %1282 = vpow2.f32 %v1208_v25 }
 0x4cf   :  { %1284 = vpow2.f32 %v1209_v26 }
 0x4d0   :  { %v1004_v55 = vpop.f32.mrf.mxu2 }
 0x4d1   :  { %v1047_v60 = vadd.f32 %v2455_v4, %v1004_v55 }
 0x4d4   :  { %v1283_v28 = vpop.eup %1282 }
 0x4d5   :  { %v1285_v29 = vpop.eup %1284  ;;  %v1015_v32 = vadd.f32 1.0, %v1283_v28 }
 0x4d6   :  { %v1016_v31 = vadd.f32 1.0, %v1285_v29 }
 0x4d7   :  { %1286 = vrcp.f32 %v1015_v32  ;;  %v1028_v44 = vand.u32 2147483648, %v1015_v32  ;;  %v1026_v50 = vand.u32 2147483647, %v1015_v32  ;;  %vm1022_vm2 = vweird.f32 %v1015_v32 }
 0x4d8   :  { %1288 = vrcp.f32 %v1016_v31  ;;  %v1043_v6 = vand.u32 2147483648, %v1016_v31  ;;  %vm1037_vm6 = vweird.f32 %v1016_v31  ;;  %v1041_v42 = vand.u32 2147483647, %v1016_v31 }
 0x4d9   :  { %v1029_v57 = vor.u32 1.1754944e-38, %v1028_v44  ;;  %vm1027_vm4 = vcmp.eq.f32.partialorder %v1026_v50, 8.507059e+37 }
 0x4da   :  { %v1044_v53 = vor.u32 1.1754944e-38, %v1043_v6  ;;  %vm1042_vm8 = vcmp.eq.f32.partialorder %v1041_v42, 8.507059e+37 }
 0x4dd   :  { %v1287_v33 = vpop.eup %1286 }
 0x4de   :  { %v1289_v35 = vpop.eup %1288  ;;  %v1018_v36 = vmul.f32 %v1287_v33, %v1015_v32  ;;  %vm1023_vm1 = vweird.f32 %v1287_v33 }
 0x4df   :  { %v1033_v39 = vmul.f32 %v1289_v35, %v1016_v31  ;;  %vm1024_vm3 = vmor %vm1022_vm2, %vm1023_vm1  ;;  %vm1038_vm5 = vweird.f32 %v1289_v35  ;;  %v2575_v31 = vld [vmem:[#allocation32_spill] sm:$0xff] }
 0x4e0   :  { %v1019_v16 = vsub.f32 1.0, %v1018_v36  ;;  %vm1039_vm7 = vmor %vm1037_vm6, %vm1038_vm5 }
 0x4e1   :  { %v1034_v19 = vsub.f32 1.0, %v1033_v39 }
 0x4e2   :  { %v1020_v48 = vmul.f32 %v1287_v33, %v1019_v16 }
 0x4e3   :  { %v1035_v52 = vmul.f32 %v1289_v35, %v1034_v19 }
 0x4e4   :  { %v1021_v56 = vadd.f32 %v1287_v33, %v1020_v48 }
 0x4e5   :  { %v1036_v61 = vadd.f32 %v1289_v35, %v1035_v52 }
 0x4e6   :  { %v1025_v58 = vsel %vm1024_vm3, %v1287_v33, %v1021_v56  ;;  %v194_v33 = vadd.f32 %v2575_v31, %v1953_v59 }
 0x4e7   :  { %v1030_v62 = vsel %vm1027_vm4, %v1029_v57, %v1025_v58  ;;  %v1040_v51 = vsel %vm1039_vm7, %v1289_v35, %v1036_v61 }
 0x4e8   :  { %v1048_v27 = vmul.f32 %v1047_v60, %v1030_v62  ;;  %v1045_v41 = vsel %vm1042_vm8, %v1044_v53, %v1040_v51 }
 0x4e9   :  { %v1051_v45 = vsub.f32 1.0, %v1045_v41  ;;  %v1053_v2 = vmul.f32 %v1045_v41, %v942_v54 }
 0x4ea   :  { %v1049_v43 = vadd.f32 %v1048_v27, %v191_v0 }
 0x4ec   :  { %1290 = vtanh.f32 %v1049_v43 }
 0x4f2   :  { %v1291_v8 = vpop.eup %1290 }
 0x4f3   :  { %v1052_v46 = vmul.f32 %v1291_v8, %v1051_v45 }
 0x4f5   :  { %v1054_v9 = vadd.f32 %v1053_v2, %v1052_v46 }
 0x4f7   :  { %1055 = vst [vmem:[%s2487_s5 + $0x30] sm:$0xff] %v1054_v9  ;;  %1075 = vmatmul.f32.vlgmr.msra.gmra.mxu3 %v1054_v9  ;;  %1095 = vmatmul.f32.vlgmr.msra.gmra.mxu0 %v1054_v9 }
 0x4f8   :  { %1115 = vmatmul.f32.vlgmr.msra.gmra.mxu1 %v1054_v9 }
 0x574   :  { %v1096_v12 = vpop.f32.mrf.mxu0 }
 0x575   :  { %v1120_v3 = vadd.f32 %v1096_v12, %v153_v49  ;;  %v1116_v22 = vpop.f32.mrf.mxu1 }
 0x576   :  { %v1159_v26 = vadd.f32 %v2455_v4, %v1116_v22 }
 0x577   :  { %v1211_v47 = vmul.f32 -1.442695, %v1120_v3 }
 0x579   :  { %1292 = vpow2.f32 %v1211_v47 }
 0x57a   :  { %v1076_v11 = vpop.f32.mrf.mxu3 }
 0x57b   :  { %v1119_v17 = vadd.f32 %v1076_v11, %v2574_v40 }
 0x57d   :  { %v1210_v1 = vmul.f32 -1.442695, %v1119_v17 }
 0x57f   :  { %v1293_v37 = vpop.eup %1292  ;;  %1294 = vpow2.f32 %v1210_v1 }
 0x580   :  { %v1128_v7 = vadd.f32 1.0, %v1293_v37 }
 0x582   :  { %1296 = vrcp.f32 %v1128_v7  ;;  %v1155_v35 = vand.u32 2147483648, %v1128_v7  ;;  %vm1149_vm14 = vweird.f32 %v1128_v7  ;;  %v1153_v39 = vand.u32 2147483647, %v1128_v7 }
 0x584   :  { %v1156_v44 = vor.u32 1.1754944e-38, %v1155_v35  ;;  %vm1154_vm0 = vcmp.eq.f32.partialorder %v1153_v39, 8.507059e+37 }
 0x585   :  { %v1295_v24 = vpop.eup %1294 }
 0x586   :  { %v1127_v5 = vadd.f32 1.0, %v1295_v24 }
 0x588   :  { %1298 = vrcp.f32 %v1127_v5  ;;  %v1297_v34 = vpop.eup %1296  ;;  %v1140_v13 = vand.u32 2147483648, %v1127_v5  ;;  %v1138_v30 = vand.u32 2147483647, %v1127_v5  ;;  %vm1134_vm10 = vweird.f32 %v1127_v5 }
 0x589   :  { %v1145_v21 = vmul.f32 %v1297_v34, %v1128_v7  ;;  %vm1150_vm13 = vweird.f32 %v1297_v34 }
 0x58a   :  { %v1141_v25 = vor.u32 1.1754944e-38, %v1140_v13  ;;  %vm1139_vm12 = vcmp.eq.f32.partialorder %v1138_v30, 8.507059e+37  ;;  %vm1151_vm15 = vmor %vm1149_vm14, %vm1150_vm13 }
 0x58b   :  { %v1146_v15 = vsub.f32 1.0, %v1145_v21 }
 0x58d   :  { %v1147_v20 = vmul.f32 %v1297_v34, %v1146_v15 }
 0x58e   :  { %v1299_v14 = vpop.eup %1298 }
 0x58f   :  { %v1130_v54 = vmul.f32 %v1299_v14, %v1127_v5  ;;  %vm1135_vm9 = vweird.f32 %v1299_v14  ;;  %v1148_v29 = vadd.f32 %v1297_v34, %v1147_v20 }
 0x590   :  { %vm1136_vm11 = vmor %vm1134_vm10, %vm1135_vm9 }
 0x591   :  { %v1131_v38 = vsub.f32 1.0, %v1130_v54  ;;  %v1152_v19 = vsel %vm1151_vm15, %v1297_v34, %v1148_v29 }
 0x592   :  { %v1157_v48 = vsel %vm1154_vm0, %v1156_v44, %v1152_v19 }
 0x593   :  { %v1132_v18 = vmul.f32 %v1299_v14, %v1131_v38  ;;  %v1163_v4 = vsub.f32 1.0, %v1157_v48  ;;  %v1165_v52 = vmul.f32 %v1157_v48, %v1054_v9 }
 0x595   :  { %v1133_v23 = vadd.f32 %v1299_v14, %v1132_v18 }
 0x597   :  { %v1137_v28 = vsel %vm1136_vm11, %v1299_v14, %v1133_v23 }
 0x598   :  { %v1142_v32 = vsel %vm1139_vm12, %v1141_v25, %v1137_v28 }
 0x599   :  { %v1160_v36 = vmul.f32 %v1159_v26, %v1142_v32 }
 0x59b   :  { %v1161_v16 = vadd.f32 %v1160_v36, %v194_v33 }
 0x59d   :  { %1300 = vtanh.f32 %v1161_v16 }
 0x5a3   :  { %v1301_v50 = vpop.eup %1300 }
 0x5a4   :  { %v1164_v55 = vmul.f32 %v1301_v50, %v1163_v4 }
 0x5a6   :  { %v1166_v56 = vadd.f32 %v1165_v52, %v1164_v55 }
 0x5a8   :  { %1167 = vst [vmem:[%s2487_s5 + $0x38] sm:$0xff] %v1166_v56 }

</bundles_post_ra>
